<compile_context>
chip_gen: v7x
topology: tpu7x:2x2x1
jax: 0.10.0
libtpu: 0.0.40
codegen_flags: <defaults>
</compile_context>

<pallas_src>
import math
import functools

import jax
import jax.numpy as jnp
from jax import lax
from jax.experimental import pallas as pl
from jax.experimental.pallas import tpu as pltpu

BN_EPS = 1e-5


def _round_up(x, m):
    return ((x + m - 1) // m) * m


# --------------------------------------------------------------------------- #
# Shared in-kernel helpers
# --------------------------------------------------------------------------- #
def _column_masks(H, W):
    """Masks (H*W, 1) for horizontally shifted taps (dx = -1 / dx = +1)."""
    p = lax.broadcasted_iota(jnp.int32, (H * W, 1), 0)
    ww = p % W
    return ww >= 1, ww <= W - 2


def _conv3x3_taps(apad_ref, get_w, pad, hw, w_img, mleft, mright):
    """Accumulate the 9 conv taps as MXU matmuls.

    apad_ref: ((2*pad + hw), Cin) f32 zero-padded flat activation (interior at
              rows [pad, pad+hw)).  get_w(i) -> (Cin, Cout) bf16 tap weight.
    Returns (hw, Cout) f32.
    """
    acc = None
    for kh in range(3):
        for kw in range(3):
            dy, dx = kh - 1, kw - 1
            d = dy * w_img + dx
            sh = apad_ref[pl.ds(pad + d, hw), :]            # shifted operand
            if dx == -1:
                sh = jnp.where(mleft, sh, 0.0)
            elif dx == 1:
                sh = jnp.where(mright, sh, 0.0)
            t = jnp.dot(sh.astype(jnp.bfloat16), get_w(kh * 3 + kw),
                        preferred_element_type=jnp.float32)
            acc = t if acc is None else acc + t
    return acc


# --------------------------------------------------------------------------- #
# Pallas kernel: standalone 3x3 conv + bias + activation (+ optional residual)
# --------------------------------------------------------------------------- #
def _make_conv3x3_kernel(H, W, Cin, Cout, act, has_res):
    HW = H * W
    PAD = _round_up(W + 1, 8)

    def kernel(x_ref, w_ref, b_ref, *rest):
        # x_ref: (HW, Cin) f32   w_ref: (9, Cin, Cout) bf16   b_ref: (1, Cout) f32
        # [res_ref: (HW, Cout) f32]   out_ref: (HW, Cout) f32
        # apad_ref: (2*PAD + HW, Cin) f32 scratch
        if has_res:
            res_ref, out_ref, apad_ref = rest
        else:
            out_ref, apad_ref = rest

        apad_ref[...] = jnp.zeros_like(apad_ref)
        apad_ref[pl.ds(PAD, HW), :] = x_ref[...]

        mleft, mright = _column_masks(H, W)
        acc = _conv3x3_taps(apad_ref, lambda i: w_ref[i], PAD, HW, W,
                            mleft, mright)
        acc = acc + b_ref[...]
        if act == "relu":
            acc = jnp.maximum(acc, 0.0)
        elif act == "lrelu":
            acc = jnp.where(acc > 0, acc, 0.1 * acc)        # LeakyReLU(0.1)
        # NOTE: residual is added after the (optional) activation; every call
        # site that passes a residual uses act="none", matching the model.
        if has_res:
            acc = acc + res_ref[...]
        out_ref[...] = acc

    return kernel


def conv3x3(x, w9, b, act="none", residual=None):
    """x: (N,H,W,Cin) f32, w9: (9,Cin,Cout) bf16, b: (1,Cout) f32 -> f32."""
    N, H, W, Cin = x.shape
    Cout = w9.shape[-1]
    HW = H * W
    PAD = _round_up(W + 1, 8)
    has_res = residual is not None

    xf = x.reshape(N, HW, Cin)
    kernel = _make_conv3x3_kernel(H, W, Cin, Cout, act, has_res)

    in_specs = [
        pl.BlockSpec((None, HW, Cin), lambda n: (n, 0, 0)),
        pl.BlockSpec((9, Cin, Cout), lambda n: (0, 0, 0)),
        pl.BlockSpec((1, Cout), lambda n: (0, 0)),
    ]
    args = [xf, w9, b]
    if has_res:
        in_specs.append(pl.BlockSpec((None, HW, Cout), lambda n: (n, 0, 0)))
        args.append(residual.reshape(N, HW, Cout))

    out = pl.pallas_call(
        kernel,
        out_shape=jax.ShapeDtypeStruct((N, HW, Cout), jnp.float32),
        grid=(N,),
        in_specs=in_specs,
        out_specs=pl.BlockSpec((None, HW, Cout), lambda n: (n, 0, 0)),
        scratch_shapes=[pltpu.VMEM((2 * PAD + HW, Cin), jnp.float32)],
        compiler_params=pltpu.CompilerParams(dimension_semantics=("parallel",)),
    )(*args)
    return out.reshape(N, H, W, Cout)


# --------------------------------------------------------------------------- #
# Pallas kernel: fused chain of ResidualGroups (one pallas_call per chain)
# --------------------------------------------------------------------------- #
def _make_group_chain_kernel(H, W, C, L):
    HW = H * W
    PAD = _round_up(W + 1, 8)

    def kernel(x_ref, w_ref, b_ref, out_ref, apad_ref, skip_ref):
        # x_ref:  (HW, C) f32           w_ref: (L*9, C, C) bf16 (this group)
        # b_ref:  (L, 1, C) f32         out_ref: (HW, C) f32
        # apad_ref: (2*PAD + HW, C) f32 running activation, zero-padded halo
        # skip_ref: (HW, C) f32         residual-group skip
        g = pl.program_id(1)

        @pl.when(g == 0)
        def _init():
            apad_ref[...] = jnp.zeros_like(apad_ref)
            apad_ref[pl.ds(PAD, HW), :] = x_ref[...]

        mleft, mright = _column_masks(H, W)
        skip_ref[...] = apad_ref[pl.ds(PAD, HW), :]

        def conv_layer(l, relu):
            wbase = l * 9
            acc = _conv3x3_taps(apad_ref, lambda i: w_ref[wbase + i],
                                PAD, HW, W, mleft, mright)
            acc = acc + b_ref[l]
            if relu:
                acc = jnp.maximum(acc, 0.0)
            return acc

        def body(l, carry):
            # fused RepVGG block: 3x3 conv + bias + ReLU
            apad_ref[pl.ds(PAD, HW), :] = conv_layer(l, True)
            return carry

        lax.fori_loop(0, L - 1, body, 0)

        # group tail conv (no activation) + group skip  (res += x)
        apad_ref[pl.ds(PAD, HW), :] = conv_layer(L - 1, False) + skip_ref[...]

        @pl.when(g == pl.num_programs(1) - 1)
        def _final():
            out_ref[...] = apad_ref[pl.ds(PAD, HW), :]

    return kernel


def run_group_chain(x, w_stack, b_stack):
    """Run a chain of ResidualGroups inside one pallas_call.

    x: (N,H,W,C) f32
    w_stack: (G, L*9, C, C) bf16   (20 fused RepVGG convs + group tail conv)
    b_stack: (G, L, 1, C) f32
    """
    N, H, W, C = x.shape
    G, L9, _, _ = w_stack.shape
    L = b_stack.shape[1]
    assert L9 == L * 9
    HW = H * W
    PAD = _round_up(W + 1, 8)

    xf = x.reshape(N, HW, C)
    kernel = _make_group_chain_kernel(H, W, C, L)

    out = pl.pallas_call(
        kernel,
        out_shape=jax.ShapeDtypeStruct((N, HW, C), jnp.float32),
        grid=(N, G),
        in_specs=[
            pl.BlockSpec((None, HW, C), lambda n, g: (n, 0, 0)),
            pl.BlockSpec((None, L9, C, C), lambda n, g: (g, 0, 0, 0)),
            pl.BlockSpec((None, L, 1, C), lambda n, g: (g, 0, 0, 0)),
        ],
        out_specs=pl.BlockSpec((None, HW, C), lambda n, g: (n, 0, 0)),
        scratch_shapes=[
            pltpu.VMEM((2 * PAD + HW, C), jnp.float32),   # padded activation
            pltpu.VMEM((HW, C), jnp.float32),             # group skip
        ],
        compiler_params=pltpu.CompilerParams(
            dimension_semantics=("parallel", "arbitrary")),
    )(xf, w_stack, b_stack)
    return out.reshape(N, H, W, C)


# --------------------------------------------------------------------------- #
# JAX glue: PixelShuffle (layout only)
# --------------------------------------------------------------------------- #
def pixel_shuffle_nhwc(x, r):
    N, H, W, Cr2 = x.shape
    C = Cr2 // (r * r)
    x = x.reshape(N, H, W, C, r, r)             # (..., c, i, j) like PyTorch
    x = x.transpose(0, 1, 4, 2, 5, 3)           # (N, H, i, W, j, C)
    return x.reshape(N, H * r, W * r, C)


# --------------------------------------------------------------------------- #
# Deterministic parameter construction (eval-mode BN folded, RepVGG fused)
# --------------------------------------------------------------------------- #
class _Keys:
    def __init__(self, key):
        self._key, self._i = key, 0

    def __call__(self):
        self._i += 1
        return jax.random.fold_in(self._key, self._i)


def _conv_w(kg, kh, kw, cin, cout, gain=0.5):
    std = gain / math.sqrt(cin * kh * kw)
    return std * jax.random.normal(kg(), (kh, kw, cin, cout), jnp.float32)


def _bn(kg, c):
    gamma = 1.0 + 0.1 * jax.random.normal(kg(), (c,), jnp.float32)
    beta = 0.05 * jax.random.normal(kg(), (c,), jnp.float32)
    mean = 0.05 * jax.random.normal(kg(), (c,), jnp.float32)
    var = 1.0 + 0.1 * jax.random.uniform(kg(), (c,), jnp.float32)
    return gamma, beta, mean, var


def _fold_bn(w, gamma, beta, mean, var):
    t = gamma / jnp.sqrt(var + BN_EPS)
    return w * t[None, None, None, :], beta - mean * t


def _make_conv(kg, cin, cout):
    w = _conv_w(kg, 3, 3, cin, cout)
    b = 0.02 * jax.random.normal(kg(), (cout,), jnp.float32)
    return w, b


def _pack_conv(w, b):
    kh, kw, cin, cout = w.shape
    return (w.reshape(kh * kw, cin, cout).astype(jnp.bfloat16),
            b.reshape(1, cout).astype(jnp.float32))


def _make_repvgg_fused(kg, c):
    # 3x3 conv (no bias) + BN
    w3e, b3e = _fold_bn(_conv_w(kg, 3, 3, c, c), *_bn(kg, c))
    # 1x1 conv (no bias) + BN -> padded to 3x3 center
    w1e, b1e = _fold_bn(_conv_w(kg, 1, 1, c, c), *_bn(kg, c))
    w1p = jnp.zeros((3, 3, c, c), jnp.float32).at[1, 1].set(w1e[0, 0])
    # identity BN branch
    g, bb, m, v = _bn(kg, c)
    t = g / jnp.sqrt(v + BN_EPS)
    wid = jnp.zeros((3, 3, c, c), jnp.float32).at[1, 1].set(jnp.diag(t))
    bid = bb - m * t
    return w3e + w1p + wid, b3e + b1e + bid


def _make_group_packed(kg, c, n_blocks):
    ws, bs = [], []
    for _ in range(n_blocks):
        w, b = _make_repvgg_fused(kg, c)
        ws.append(w)
        bs.append(b)
    tw, tb = _make_conv(kg, c, c)                # group tail conv
    ws.append(tw)
    bs.append(tb)
    L = n_blocks + 1
    w = jnp.stack(ws).reshape(L * 9, c, c).astype(jnp.bfloat16)
    b = jnp.stack(bs).reshape(L, 1, c).astype(jnp.float32)
    return w, b


def build_params(key, in_ch, scale, n_feats=64, n_resgroups=8, n_resblocks=20):
    kg = _Keys(key)

    def packed_conv(cin, cout):
        return _pack_conv(*_make_conv(kg, cin, cout))

    clean_c1 = packed_conv(in_ch, n_feats)
    cg_w, cg_b = _make_group_packed(kg, n_feats, n_resblocks)
    clean_group = (cg_w[None], cg_b[None])                  # G = 1
    clean_c2 = packed_conv(n_feats, in_ch)
    head = packed_conv(in_ch, n_feats)

    gws, gbs = [], []
    for _ in range(n_resgroups):
        gw, gb = _make_group_packed(kg, n_feats, n_resblocks)
        gws.append(gw)
        gbs.append(gb)
    body_groups = (jnp.stack(gws), jnp.stack(gbs))          # (8, 189, 64, 64)

    body_tail = packed_conv(n_feats, n_feats)

    up_stages, up_factors = [], []
    if scale & (scale - 1) == 0:                            # power of two
        for _ in range(int(math.log2(scale))):
            up_stages.append(packed_conv(n_feats, 4 * n_feats))
            up_factors.append(2)
    elif scale == 3:
        up_stages.append(packed_conv(n_feats, 9 * n_feats))
        up_factors.append(3)
    else:
        raise ValueError("unsupported scale")

    tail = packed_conv(n_feats, 1)

    params = {
        "clean_c1": clean_c1,
        "clean_group": clean_group,
        "clean_c2": clean_c2,
        "head": head,
        "body_groups": body_groups,
        "body_tail": body_tail,
        "up": up_stages,
        "tail": tail,
    }
    return params, tuple(up_factors)


# --------------------------------------------------------------------------- #
# Forward pass (matches get_model.forward)
# --------------------------------------------------------------------------- #
@functools.partial(jax.jit, static_argnames="up_factors")
def forward(params, x, up_factors):
    # ---- clean ----
    c = conv3x3(x, *params["clean_c1"], act="lrelu")          # conv + LeakyReLU
    c = run_group_chain(c, *params["clean_group"])            # ResidualGroup
    clean = conv3x3(c, *params["clean_c2"])
    # ---- head ----
    h = conv3x3(clean, *params["head"])
    # ---- body: 8 residual groups fused in one kernel, then conv + global skip
    b = run_group_chain(h, *params["body_groups"])
    b = conv3x3(b, *params["body_tail"], residual=h)          # body(x) + x
    # ---- upscale (conv -> PixelShuffle) ----
    u = b
    for (w9, bias), r in zip(params["up"], up_factors):
        u = conv3x3(u, w9, bias)
        u = pixel_shuffle_nhwc(u, r)
    up_features = u
    # ---- tail ----
    sr = conv3x3(up_features, *params["tail"])
    return {"sr": sr, "up_features": up_features, "clean": clean}


# --------------------------------------------------------------------------- #
if __name__ == "__main__":
    SCALE = 2          # args.scale_factor
    IN_CH = 3          # args.in_channels
    N, H, W = 1, 16, 16

    root = jax.random.PRNGKey(0)
    params, up_factors = build_params(jax.random.fold_in(root, 1), IN_CH, SCALE)
    x = jax.random.normal(jax.random.fold_in(root, 2), (N, H, W, IN_CH), jnp.float32)

    def _close(a, b, atol, rtol):
        return bool(jnp.all(jnp.abs(a - b) <= atol + rtol * jnp.abs(b)))

    # --- self-check 1: Pallas conv3x3 vs lax.conv (bf16 vs f32, loose tol) ---
    wt = 0.02 * jax.random.normal(jax.random.fold_in(root, 3), (3, 3, 64, 64), jnp.float32)
    bt = 0.02 * jax.random.normal(jax.random.fold_in(root, 4), (64,), jnp.float32)
    xt = jax.random.normal(jax.random.fold_in(root, 5), (1, 16, 16, 64), jnp.float32)
    got = conv3x3(xt, *_pack_conv(wt, bt), act="relu")
    ref = lax.conv_general_dilated(xt, wt, (1, 1), "SAME",
                                   dimension_numbers=("NHWC", "HWIO", "NHWC"))
    ref = jnp.maximum(ref + bt.reshape(1, 1, 1, 64), 0.0)
    assert _close(got, ref, atol=5e-2, rtol=5e-2), "conv3x3 kernel mismatch"

    # --- self-check 2: fused group-chain vs composed per-conv kernels -------
    gw, gb = params["clean_group"]
    xt2 = jax.random.normal(jax.random.fold_in(root, 6), (1, 16, 16, 64), jnp.float32)
    got2 = run_group_chain(xt2, gw, gb)
    L = gb.shape[1]
    hh = xt2
    for l in range(L - 1):
        hh = conv3x3(hh, gw[0, l * 9:(l + 1) * 9], gb[0, l], act="relu")
    ref2 = conv3x3(hh, gw[0, (L - 1) * 9:], gb[0, L - 1], residual=xt2)
    assert _close(got2, ref2, atol=1e-3, rtol=1e-3), "group-chain kernel mismatch"

    # --- full forward --------------------------------------------------------
    out = forward(params, x, up_factors)
    out = jax.block_until_ready(out)

    assert out["sr"].shape == (N, H * SCALE, W * SCALE, 1)
    assert out["up_features"].shape == (N, H * SCALE, W * SCALE, 64)
    assert out["clean"].shape == (N, H, W, IN_CH)
    assert bool(jnp.all(jnp.isfinite(out["sr"])))
    assert bool(jnp.all(jnp.isfinite(out["up_features"])))
    assert bool(jnp.all(jnp.isfinite(out["clean"])))

    print("KERNEL_OK")
</pallas_src>

<mosaic_0001>
module attributes {stable_mosaic.version = 11 : i64} {
  func.func @kernel(%arg0: i32, %arg1: memref<1x256x64xf32, #tpu.memory_space<vmem>>, %arg2: memref<9x64x64xbf16, #tpu.memory_space<vmem>>, %arg3: memref<1x64xf32, #tpu.memory_space<vmem>>, %arg4: memref<1x256x64xf32, #tpu.memory_space<vmem>>, %arg5: memref<304x64xf32, #tpu.memory_space<vmem>>) attributes {dimension_semantics = [#tpu.dimension_semantics<parallel>], iteration_bounds = array<i64: 1>, scalar_prefetch = 0 : i64, scratch_operands = 1 : i64, tpu.core_type = #tpu.core_type<tc>, window_params = [{transform_indices = @transform_0, window_bounds = array<i64: 1, 256, 64>}, {pipeline_mode = #tpu.pipeline_mode<synchronous>, transform_indices = @transform_1, window_bounds = array<i64: 9, 64, 64>}, {pipeline_mode = #tpu.pipeline_mode<synchronous>, transform_indices = @transform_2, window_bounds = array<i64: 1, 64>}, {transform_indices = @transform_3, window_bounds = array<i64: 1, 256, 64>}]} {
    %cst = arith.constant 0.000000e+00 : f32
    %0 = vector.broadcast %cst : f32 to vector<304x64xf32>
    %c0 = arith.constant 0 : index
    %c0_0 = arith.constant 0 : index
    %1 = vector.load %arg5[%c0, %c0_0] : memref<304x64xf32, #tpu.memory_space<vmem>>, vector<304x64xf32>
    tpu.vector_store %arg5[%c0, %c0_0], %0 {strides = array<i32>} : memref<304x64xf32, #tpu.memory_space<vmem>>, vector<304x64xf32>,
    %c0_1 = arith.constant 0 : index
    %c0_2 = arith.constant 0 : index
    %c0_3 = arith.constant 0 : index
    %2 = vector.load %arg1[%c0_1, %c0_2, %c0_3] : memref<1x256x64xf32, #tpu.memory_space<vmem>>, vector<1x256x64xf32>
    %3 = vector.shape_cast %2 : vector<1x256x64xf32> to vector<256x64xf32>
    %c24 = arith.constant 24 : index
    %c0_4 = arith.constant 0 : index
    %4 = vector.load %arg5[%c24, %c0_4] : memref<304x64xf32, #tpu.memory_space<vmem>>, vector<256x64xf32>
    tpu.vector_store %arg5[%c24, %c0_4], %3 {strides = array<i32>} : memref<304x64xf32, #tpu.memory_space<vmem>>, vector<256x64xf32>,
    %5 = tpu.iota {dimensions = array<i32: 0>} : vector<256x1xi32>
    %c16_i32 = arith.constant 16 : i32
    %c0_i32 = arith.constant 0 : i32
    %6 = arith.cmpi eq, %c16_i32, %c0_i32 : i32
    %c1_i32 = arith.constant 1 : i32
    %7 = arith.select %6, %c1_i32, %c16_i32 : i32
    %8 = vector.broadcast %7 : i32 to vector<256x1xi32>
    %9 = arith.remsi %5, %8 : vector<256x1xi32>
    %c0_i32_5 = arith.constant 0 : i32
    %10 = vector.broadcast %c0_i32_5 : i32 to vector<256x1xi32>
    %11 = arith.cmpi ne, %9, %10 : vector<256x1xi32>
    %c0_i32_6 = arith.constant 0 : i32
    %12 = vector.broadcast %c0_i32_6 : i32 to vector<256x1xi32>
    %13 = arith.cmpi slt, %9, %12 : vector<256x1xi32>
    %c0_i32_7 = arith.constant 0 : i32
    %14 = arith.cmpi slt, %7, %c0_i32_7 : i32
    %15 = vector.broadcast %14 : i1 to vector<256x1xi1>
    %16 = vector.broadcast %15 : vector<256x1xi1> to vector<256x1xi1>
    %17 = arith.xori %13, %16 : vector<256x1xi1>
    %18 = arith.andi %17, %11 : vector<256x1xi1>
    %19 = vector.broadcast %7 : i32 to vector<256x1xi32>
    %20 = arith.addi %9, %19 : vector<256x1xi32>
    %21 = arith.select %18, %20, %9 : vector<256x1xi1>, vector<256x1xi32>
    %c1_i32_8 = arith.constant 1 : i32
    %22 = vector.broadcast %c1_i32_8 : i32 to vector<256x1xi32>
    %23 = arith.cmpi sge, %21, %22 : vector<256x1xi32>
    %c14_i32 = arith.constant 14 : i32
    %24 = vector.broadcast %c14_i32 : i32 to vector<256x1xi32>
    %25 = arith.cmpi sle, %21, %24 : vector<256x1xi32>
    %c7 = arith.constant 7 : index
    %c0_9 = arith.constant 0 : index
    %26 = vector.load %arg5[%c7, %c0_9] : memref<304x64xf32, #tpu.memory_space<vmem>>, vector<256x64xf32>
    %cst_10 = arith.constant 0.000000e+00 : f32
    %27 = vector.shape_cast %23 : vector<256x1xi1> to vector<256x1xi1>
    %28 = vector.broadcast %27 : vector<256x1xi1> to vector<256x64xi1>
    %29 = vector.broadcast %cst_10 : f32 to vector<256x64xf32>
    %30 = arith.select %28, %26, %29 : vector<256x64xi1>, vector<256x64xf32>
    %31 = arith.truncf %30 : vector<256x64xf32> to vector<256x64xbf16>
    %c0_11 = arith.constant 0 : index
    %c0_12 = arith.constant 0 : index
    %c0_13 = arith.constant 0 : index
    %32 = vector.load %arg2[%c0_11, %c0_12, %c0_13] : memref<9x64x64xbf16, #tpu.memory_space<vmem>>, vector<1x64x64xbf16>
    %33 = vector.shape_cast %32 : vector<1x64x64xbf16> to vector<64x64xbf16>
    %cst_14 = arith.constant dense<0.000000e+00> : vector<256x64xf32>
    %34 = tpu.matmul %31, %33, %cst_14 {dimension_numbers = #tpu.dot_dimension_numbers<[1], [0], [0], [1], [0, 0, 1, 1], [], []>} : vector<256x64xbf16>, vector<64x64xbf16>, vector<256x64xf32> -> vector<256x64xf32>
    %c8 = arith.constant 8 : index
    %c0_15 = arith.constant 0 : index
    %35 = vector.load %arg5[%c8, %c0_15] : memref<304x64xf32, #tpu.memory_space<vmem>>, vector<256x64xf32>
    %36 = arith.truncf %35 : vector<256x64xf32> to vector<256x64xbf16>
    %c1 = arith.constant 1 : index
    %c0_16 = arith.constant 0 : index
    %c0_17 = arith.constant 0 : index
    %37 = vector.load %arg2[%c1, %c0_16, %c0_17] : memref<9x64x64xbf16, #tpu.memory_space<vmem>>, vector<1x64x64xbf16>
    %38 = vector.shape_cast %37 : vector<1x64x64xbf16> to vector<64x64xbf16>
    %cst_18 = arith.constant dense<0.000000e+00> : vector<256x64xf32>
    %39 = tpu.matmul %36, %38, %cst_18 {dimension_numbers = #tpu.dot_dimension_numbers<[1], [0], [0], [1], [0, 0, 1, 1], [], []>} : vector<256x64xbf16>, vector<64x64xbf16>, vector<256x64xf32> -> vector<256x64xf32>
    %40 = arith.addf %34, %39 : vector<256x64xf32>
    %c9 = arith.constant 9 : index
    %c0_19 = arith.constant 0 : index
    %41 = vector.load %arg5[%c9, %c0_19] : memref<304x64xf32, #tpu.memory_space<vmem>>, vector<256x64xf32>
    %cst_20 = arith.constant 0.000000e+00 : f32
    %42 = vector.shape_cast %25 : vector<256x1xi1> to vector<256x1xi1>
    %43 = vector.broadcast %42 : vector<256x1xi1> to vector<256x64xi1>
    %44 = vector.broadcast %cst_20 : f32 to vector<256x64xf32>
    %45 = arith.select %43, %41, %44 : vector<256x64xi1>, vector<256x64xf32>
    %46 = arith.truncf %45 : vector<256x64xf32> to vector<256x64xbf16>
    %c2 = arith.constant 2 : index
    %c0_21 = arith.constant 0 : index
    %c0_22 = arith.constant 0 : index
    %47 = vector.load %arg2[%c2, %c0_21, %c0_22] : memref<9x64x64xbf16, #tpu.memory_space<vmem>>, vector<1x64x64xbf16>
    %48 = vector.shape_cast %47 : vector<1x64x64xbf16> to vector<64x64xbf16>
    %cst_23 = arith.constant dense<0.000000e+00> : vector<256x64xf32>
    %49 = tpu.matmul %46, %48, %cst_23 {dimension_numbers = #tpu.dot_dimension_numbers<[1], [0], [0], [1], [0, 0, 1, 1], [], []>} : vector<256x64xbf16>, vector<64x64xbf16>, vector<256x64xf32> -> vector<256x64xf32>
    %50 = arith.addf %40, %49 : vector<256x64xf32>
    %c23 = arith.constant 23 : index
    %c0_24 = arith.constant 0 : index
    %51 = vector.load %arg5[%c23, %c0_24] : memref<304x64xf32, #tpu.memory_space<vmem>>, vector<256x64xf32>
    %cst_25 = arith.constant 0.000000e+00 : f32
    %52 = vector.shape_cast %23 : vector<256x1xi1> to vector<256x1xi1>
    %53 = vector.broadcast %52 : vector<256x1xi1> to vector<256x64xi1>
    %54 = vector.broadcast %cst_25 : f32 to vector<256x64xf32>
    %55 = arith.select %53, %51, %54 : vector<256x64xi1>, vector<256x64xf32>
    %56 = arith.truncf %55 : vector<256x64xf32> to vector<256x64xbf16>
    %c3 = arith.constant 3 : index
    %c0_26 = arith.constant 0 : index
    %c0_27 = arith.constant 0 : index
    %57 = vector.load %arg2[%c3, %c0_26, %c0_27] : memref<9x64x64xbf16, #tpu.memory_space<vmem>>, vector<1x64x64xbf16>
    %58 = vector.shape_cast %57 : vector<1x64x64xbf16> to vector<64x64xbf16>
    %cst_28 = arith.constant dense<0.000000e+00> : vector<256x64xf32>
    %59 = tpu.matmul %56, %58, %cst_28 {dimension_numbers = #tpu.dot_dimension_numbers<[1], [0], [0], [1], [0, 0, 1, 1], [], []>} : vector<256x64xbf16>, vector<64x64xbf16>, vector<256x64xf32> -> vector<256x64xf32>
    %60 = arith.addf %50, %59 : vector<256x64xf32>
    %c24_29 = arith.constant 24 : index
    %c0_30 = arith.constant 0 : index
    %61 = vector.load %arg5[%c24_29, %c0_30] : memref<304x64xf32, #tpu.memory_space<vmem>>, vector<256x64xf32>
    %62 = arith.truncf %61 : vector<256x64xf32> to vector<256x64xbf16>
    %c4 = arith.constant 4 : index
    %c0_31 = arith.constant 0 : index
    %c0_32 = arith.constant 0 : index
    %63 = vector.load %arg2[%c4, %c0_31, %c0_32] : memref<9x64x64xbf16, #tpu.memory_space<vmem>>, vector<1x64x64xbf16>
    %64 = vector.shape_cast %63 : vector<1x64x64xbf16> to vector<64x64xbf16>
    %cst_33 = arith.constant dense<0.000000e+00> : vector<256x64xf32>
    %65 = tpu.matmul %62, %64, %cst_33 {dimension_numbers = #tpu.dot_dimension_numbers<[1], [0], [0], [1], [0, 0, 1, 1], [], []>} : vector<256x64xbf16>, vector<64x64xbf16>, vector<256x64xf32> -> vector<256x64xf32>
    %66 = arith.addf %60, %65 : vector<256x64xf32>
    %c25 = arith.constant 25 : index
    %c0_34 = arith.constant 0 : index
    %67 = vector.load %arg5[%c25, %c0_34] : memref<304x64xf32, #tpu.memory_space<vmem>>, vector<256x64xf32>
    %cst_35 = arith.constant 0.000000e+00 : f32
    %68 = vector.shape_cast %25 : vector<256x1xi1> to vector<256x1xi1>
    %69 = vector.broadcast %68 : vector<256x1xi1> to vector<256x64xi1>
    %70 = vector.broadcast %cst_35 : f32 to vector<256x64xf32>
    %71 = arith.select %69, %67, %70 : vector<256x64xi1>, vector<256x64xf32>
    %72 = arith.truncf %71 : vector<256x64xf32> to vector<256x64xbf16>
    %c5 = arith.constant 5 : index
    %c0_36 = arith.constant 0 : index
    %c0_37 = arith.constant 0 : index
    %73 = vector.load %arg2[%c5, %c0_36, %c0_37] : memref<9x64x64xbf16, #tpu.memory_space<vmem>>, vector<1x64x64xbf16>
    %74 = vector.shape_cast %73 : vector<1x64x64xbf16> to vector<64x64xbf16>
    %cst_38 = arith.constant dense<0.000000e+00> : vector<256x64xf32>
    %75 = tpu.matmul %72, %74, %cst_38 {dimension_numbers = #tpu.dot_dimension_numbers<[1], [0], [0], [1], [0, 0, 1, 1], [], []>} : vector<256x64xbf16>, vector<64x64xbf16>, vector<256x64xf32> -> vector<256x64xf32>
    %76 = arith.addf %66, %75 : vector<256x64xf32>
    %c39 = arith.constant 39 : index
    %c0_39 = arith.constant 0 : index
    %77 = vector.load %arg5[%c39, %c0_39] : memref<304x64xf32, #tpu.memory_space<vmem>>, vector<256x64xf32>
    %cst_40 = arith.constant 0.000000e+00 : f32
    %78 = vector.shape_cast %23 : vector<256x1xi1> to vector<256x1xi1>
    %79 = vector.broadcast %78 : vector<256x1xi1> to vector<256x64xi1>
    %80 = vector.broadcast %cst_40 : f32 to vector<256x64xf32>
    %81 = arith.select %79, %77, %80 : vector<256x64xi1>, vector<256x64xf32>
    %82 = arith.truncf %81 : vector<256x64xf32> to vector<256x64xbf16>
    %c6 = arith.constant 6 : index
    %c0_41 = arith.constant 0 : index
    %c0_42 = arith.constant 0 : index
    %83 = vector.load %arg2[%c6, %c0_41, %c0_42] : memref<9x64x64xbf16, #tpu.memory_space<vmem>>, vector<1x64x64xbf16>
    %84 = vector.shape_cast %83 : vector<1x64x64xbf16> to vector<64x64xbf16>
    %cst_43 = arith.constant dense<0.000000e+00> : vector<256x64xf32>
    %85 = tpu.matmul %82, %84, %cst_43 {dimension_numbers = #tpu.dot_dimension_numbers<[1], [0], [0], [1], [0, 0, 1, 1], [], []>} : vector<256x64xbf16>, vector<64x64xbf16>, vector<256x64xf32> -> vector<256x64xf32>
    %86 = arith.addf %76, %85 : vector<256x64xf32>
    %c40 = arith.constant 40 : index
    %c0_44 = arith.constant 0 : index
    %87 = vector.load %arg5[%c40, %c0_44] : memref<304x64xf32, #tpu.memory_space<vmem>>, vector<256x64xf32>
    %88 = arith.truncf %87 : vector<256x64xf32> to vector<256x64xbf16>
    %c7_45 = arith.constant 7 : index
    %c0_46 = arith.constant 0 : index
    %c0_47 = arith.constant 0 : index
    %89 = vector.load %arg2[%c7_45, %c0_46, %c0_47] : memref<9x64x64xbf16, #tpu.memory_space<vmem>>, vector<1x64x64xbf16>
    %90 = vector.shape_cast %89 : vector<1x64x64xbf16> to vector<64x64xbf16>
    %cst_48 = arith.constant dense<0.000000e+00> : vector<256x64xf32>
    %91 = tpu.matmul %88, %90, %cst_48 {dimension_numbers = #tpu.dot_dimension_numbers<[1], [0], [0], [1], [0, 0, 1, 1], [], []>} : vector<256x64xbf16>, vector<64x64xbf16>, vector<256x64xf32> -> vector<256x64xf32>
    %92 = arith.addf %86, %91 : vector<256x64xf32>
    %c41 = arith.constant 41 : index
    %c0_49 = arith.constant 0 : index
    %93 = vector.load %arg5[%c41, %c0_49] : memref<304x64xf32, #tpu.memory_space<vmem>>, vector<256x64xf32>
    %cst_50 = arith.constant 0.000000e+00 : f32
    %94 = vector.shape_cast %25 : vector<256x1xi1> to vector<256x1xi1>
    %95 = vector.broadcast %94 : vector<256x1xi1> to vector<256x64xi1>
    %96 = vector.broadcast %cst_50 : f32 to vector<256x64xf32>
    %97 = arith.select %95, %93, %96 : vector<256x64xi1>, vector<256x64xf32>
    %98 = arith.truncf %97 : vector<256x64xf32> to vector<256x64xbf16>
    %c8_51 = arith.constant 8 : index
    %c0_52 = arith.constant 0 : index
    %c0_53 = arith.constant 0 : index
    %99 = vector.load %arg2[%c8_51, %c0_52, %c0_53] : memref<9x64x64xbf16, #tpu.memory_space<vmem>>, vector<1x64x64xbf16>
    %100 = vector.shape_cast %99 : vector<1x64x64xbf16> to vector<64x64xbf16>
    %cst_54 = arith.constant dense<0.000000e+00> : vector<256x64xf32>
    %101 = tpu.matmul %98, %100, %cst_54 {dimension_numbers = #tpu.dot_dimension_numbers<[1], [0], [0], [1], [0, 0, 1, 1], [], []>} : vector<256x64xbf16>, vector<64x64xbf16>, vector<256x64xf32> -> vector<256x64xf32>
    %102 = arith.addf %92, %101 : vector<256x64xf32>
    %c0_55 = arith.constant 0 : index
    %c0_56 = arith.constant 0 : index
    %103 = vector.load %arg3[%c0_55, %c0_56] : memref<1x64xf32, #tpu.memory_space<vmem>>, vector<1x64xf32>
    %104 = vector.broadcast %103 : vector<1x64xf32> to vector<256x64xf32>
    %105 = arith.addf %102, %104 : vector<256x64xf32>
    %cst_57 = arith.constant 0.000000e+00 : f32
    %106 = vector.broadcast %cst_57 : f32 to vector<256x64xf32>
    %107 = arith.maximumf %105, %106 : vector<256x64xf32>
    %c0_58 = arith.constant 0 : index
    %c0_59 = arith.constant 0 : index
    %c0_60 = arith.constant 0 : index
    %108 = vector.load %arg4[%c0_58, %c0_59, %c0_60] : memref<1x256x64xf32, #tpu.memory_space<vmem>>, vector<1x256x64xf32>
    %109 = vector.shape_cast %108 : vector<1x256x64xf32> to vector<256x64xf32>
    %110 = vector.shape_cast %107 : vector<256x64xf32> to vector<1x256x64xf32>
    tpu.vector_store %arg4[%c0_58, %c0_59, %c0_60], %110 {strides = array<i32>} : memref<1x256x64xf32, #tpu.memory_space<vmem>>, vector<1x256x64xf32>,
    return
  }
  func.func @transform_0(%arg0: i32) -> (i32, i32, i32) {
    %c0_i32 = arith.constant 0 : i32
    %c0_i32_0 = arith.constant 0 : i32
    %c0_i32_1 = arith.constant 0 : i32
    return %arg0, %c0_i32, %c0_i32_0 : i32, i32, i32
  }
  func.func @transform_1(%arg0: i32) -> (i32, i32, i32) {
    %c0_i32 = arith.constant 0 : i32
    %c0_i32_0 = arith.constant 0 : i32
    %c0_i32_1 = arith.constant 0 : i32
    %c0_i32_2 = arith.constant 0 : i32
    return %c0_i32, %c0_i32_0, %c0_i32_1 : i32, i32, i32
  }
  func.func @transform_2(%arg0: i32) -> (i32, i32) {
    %c0_i32 = arith.constant 0 : i32
    %c0_i32_0 = arith.constant 0 : i32
    %c0_i32_1 = arith.constant 0 : i32
    return %c0_i32, %c0_i32_0 : i32, i32
  }
  func.func @transform_3(%arg0: i32) -> (i32, i32, i32) {
    %c0_i32 = arith.constant 0 : i32
    %c0_i32_0 = arith.constant 0 : i32
    %c0_i32_1 = arith.constant 0 : i32
    return %arg0, %c0_i32, %c0_i32_0 : i32, i32, i32
  }
}

</mosaic_0001>

<bundles_post_ra>
// kernel: tpu_custom_call.1
= control target key start
LH: loop header
LB: loop body
LE: loop exit
PB: predicated region body
PF: predicated region fallthrough
CT: control target
= control target key end

     0   :  { %vm6294_vm0 = vcmask 523264   ;;  %v4949_v1 = vmov 0.0   ;;  %v118_v36 = vlaneseq  ;;  %s6287_s1 = inlined_call_operand.vmem [shape: bf16[9,64,64], index: 1, kind: input, shape index: {}]   ;;  %s6288_s0 = inlined_call_operand.vmem [shape: f32[1,256,64], index: 0, kind: input, shape index: {}]   ;;  %s6289_s2 = inlined_call_operand.vmem [shape: f32[1,64], index: 2, kind: input, shape index: {}]   ;;  %s6290_s3 = inlined_call_operand.vmem [shape: f32[1,256,64], index: 3, kind: output, shape index: {}]  }
   0x1   :  { %v4909_v0 = vld [vmem:[%s6287_s1 + $0x20] sm:$0xff]   ;;  %17 = vst.msk [vmem:[#allocation2 + $0x8] sm:$0xff] %vm6294_vm0, %v4949_v1  ;;  %18 = vst.msk [vmem:[#allocation2 + $0x10] sm:$0xff] %vm6294_vm0, %v4949_v1  ;;  %v4911_v3 = vld [vmem:[%s6287_s1 + $0x28] sm:$0xff]  }
   0x2   :  { %16 = vst.msk [vmem:[#allocation2] sm:$0xff] %vm6294_vm0, %v4949_v1  ;;  %19 = vst.msk [vmem:[#allocation2 + $0x18] sm:$0xff] %vm6294_vm0, %v4949_v1  ;;  %v4910_v2 = vld [vmem:[%s6287_s1 + $0x80] sm:$0xff]   ;;  %4284 = vmatprep.subr.bf16.mxu1 %v4909_v0  ;;  %v4912_v4 = vld [vmem:[%s6287_s1 + $0x88] sm:$0xff]   ;;  %v5117_v47 = vshrl.u32 %v118_v36, 7 }
   0x3   :  { %20 = vst.msk [vmem:[#allocation2 + $0x20] sm:$0xff] %vm6294_vm0, %v4949_v1  ;;  %21 = vst.msk [vmem:[#allocation2 + $0x28] sm:$0xff] %vm6294_vm0, %v4949_v1  ;;  %4444 = vmatprep.subr.bf16.mxu0 %v4910_v2  ;;  %4285 = vmatpush3.bf16.msra.mxu1 %v4909_v0  ;;  %v4913_v5 = vld [vmem:[%s6287_s1 + $0x30] sm:$0xff]   ;;  %v4915_v7 = vld [vmem:[%s6287_s1 + $0x38] sm:$0xff]  }
   0x4   :  { %22 = vst.msk [vmem:[#allocation2 + $0x30] sm:$0xff] %vm6294_vm0, %v4949_v1  ;;  %23 = vst.msk [vmem:[#allocation2 + $0x38] sm:$0xff] %vm6294_vm0, %v4949_v1  ;;  %4445 = vmatpush3.bf16.msra.mxu0 %v4910_v2  ;;  %4286 = vmatprep.subr.bf16.mxu1 %v4911_v3  ;;  %v4914_v6 = vld [vmem:[%s6287_s1 + $0x90] sm:$0xff]   ;;  %v4916_v8 = vld [vmem:[%s6287_s1 + $0x98] sm:$0xff]   ;;  %v120_v54 = vadd.s32 8, %v5117_v47 }
   0x5   :  { %24 = vst.msk [vmem:[#allocation2 + $0x40] sm:$0xff] %vm6294_vm0, %v4949_v1  ;;  %25 = vst.msk [vmem:[#allocation2 + $0x48] sm:$0xff] %vm6294_vm0, %v4949_v1  ;;  %4446 = vmatprep.subr.bf16.mxu0 %v4912_v4  ;;  %v54_v11 = vld [vmem:[%s6288_s0] sm:$0xff]  ;;  %v55_v13 = vld [vmem:[%s6288_s0 + $0x8] sm:$0xff] }
   0x6   :  { %26 = vst.msk [vmem:[#allocation2 + $0x50] sm:$0xff] %vm6294_vm0, %v4949_v1  ;;  %27 = vst.msk [vmem:[#allocation2 + $0x58] sm:$0xff] %vm6294_vm0, %v4949_v1  ;;  %v4917_v14 = vld [vmem:[%s6287_s1] sm:$0xff]   ;;  %v56_v15 = vld [vmem:[%s6288_s0 + $0x10] sm:$0xff]  ;;  %v162_v62 = vand.u32 15, %v120_v54 }
   0x7   :  { %28 = vst.msk [vmem:[#allocation2 + $0x60] sm:$0xff] %vm6294_vm0, %v4949_v1  ;;  %29 = vst.msk [vmem:[#allocation2 + $0x68] sm:$0xff] %vm6294_vm0, %v4949_v1  ;;  %4287 = vmatpush3.bf16.msra.mxu1 %v4911_v3  ;;  %v57_v16 = vld [vmem:[%s6288_s0 + $0x18] sm:$0xff]  ;;  %v4918_v17 = vld [vmem:[%s6287_s1 + $0xa0] sm:$0xff]  }
   0x8   :  { %30 = vst.msk [vmem:[#allocation2 + $0x70] sm:$0xff] %vm6294_vm0, %v4949_v1  ;;  %31 = vst.msk [vmem:[#allocation2 + $0x78] sm:$0xff] %vm6294_vm0, %v4949_v1  ;;  %4447 = vmatpush3.bf16.msra.mxu0 %v4912_v4  ;;  %4288 = vmatprep.subr.bf16.mxu1 %v4913_v5  ;;  %v751_v9 = vld [vmem:[#allocation2 + $0x8] sm:$0xff]  ;;  %v752_v10 = vld [vmem:[#allocation2 + $0x10] sm:$0xff]  ;;  %vm5173_vm1 = vcmp.le.s32.totalorder %v162_v62, 14 }
   0x9   :  { %32 = vst.msk [vmem:[#allocation2 + $0x80] sm:$0xff] %vm6294_vm0, %v4949_v1  ;;  %33 = vst.msk [vmem:[#allocation2 + $0x88] sm:$0xff] %vm6294_vm0, %v4949_v1  ;;  %4448 = vmatprep.subr.bf16.mxu0 %v4914_v6  ;;  %v783_v12 = vpack.c.bf16 %v752_v10, %v751_v9  ;;  %v58_v18 = vld [vmem:[%s6288_s0 + $0x20] sm:$0xff]  ;;  %v59_v19 = vld [vmem:[%s6288_s0 + $0x28] sm:$0xff] }
   0xa   :  { %34 = vst.msk [vmem:[#allocation2 + $0x90] sm:$0xff] %vm6294_vm0, %v4949_v1  ;;  %35 = vst.msk [vmem:[#allocation2 + $0x98] sm:$0xff] %vm6294_vm0, %v4949_v1  ;;  %v60_v20 = vld [vmem:[%s6288_s0 + $0x30] sm:$0xff]  ;;  %v61_v21 = vld [vmem:[%s6288_s0 + $0x38] sm:$0xff] }
   0xb   :  { %36 = vst.msk [vmem:[#allocation2 + $0xa0] sm:$0xff] %vm6294_vm0, %v4949_v1  ;;  %37 = vst.msk [vmem:[#allocation2 + $0xa8] sm:$0xff] %vm6294_vm0, %v4949_v1  ;;  %4289 = vmatpush3.bf16.msra.mxu1 %v4913_v5  ;;  %4292 = vmatprep.mubr.msk.bf16.mxu1 %vm6294_vm0, %v783_v12  ;;  %v62_v22 = vld [vmem:[%s6288_s0 + $0x40] sm:$0xff]  ;;  %v63_v23 = vld [vmem:[%s6288_s0 + $0x48] sm:$0xff] }
   0xc   :  { %38 = vst.msk [vmem:[#allocation2 + $0xb0] sm:$0xff] %vm6294_vm0, %v4949_v1  ;;  %39 = vst.msk [vmem:[#allocation2 + $0xb8] sm:$0xff] %vm6294_vm0, %v4949_v1  ;;  %4449 = vmatpush3.bf16.msra.mxu0 %v4914_v6  ;;  %4290 = vmatprep.subr.bf16.mxu1 %v4915_v7  ;;  %v64_v25 = vld [vmem:[%s6288_s0 + $0x50] sm:$0xff]  ;;  %v65_v26 = vld [vmem:[%s6288_s0 + $0x58] sm:$0xff] }
   0xd   :  { %40 = vst.msk [vmem:[#allocation2 + $0xc0] sm:$0xff] %vm6294_vm0, %v4949_v1  ;;  %41 = vst.msk [vmem:[#allocation2 + $0xc8] sm:$0xff] %vm6294_vm0, %v4949_v1  ;;  %4450 = vmatprep.subr.bf16.mxu0 %v4916_v8  ;;  %v4919_v31 = vld [vmem:[%s6287_s1 + $0xa8] sm:$0xff]   ;;  %v66_v33 = vld [vmem:[%s6288_s0 + $0x60] sm:$0xff] }
   0xe   :  { %42 = vst.msk [vmem:[#allocation2 + $0xd0] sm:$0xff] %vm6294_vm0, %v4949_v1  ;;  %43 = vst.msk [vmem:[#allocation2 + $0xd8] sm:$0xff] %vm6294_vm0, %v4949_v1  ;;  %v67_v34 = vld [vmem:[%s6288_s0 + $0x68] sm:$0xff]  ;;  %v68_v35 = vld [vmem:[%s6288_s0 + $0x70] sm:$0xff] }
   0xf   :  { %44 = vst.msk [vmem:[#allocation2 + $0xe0] sm:$0xff] %vm6294_vm0, %v4949_v1  ;;  %45 = vst.msk [vmem:[#allocation2 + $0xe8] sm:$0xff] %vm6294_vm0, %v4949_v1  ;;  %4291 = vmatpush3.bf16.msra.mxu1 %v4915_v7  ;;  %v4920_v39 = vld [vmem:[%s6287_s1 + $0x8] sm:$0xff]   ;;  %v69_v41 = vld [vmem:[%s6288_s0 + $0x78] sm:$0xff] }
  0x10   :  { %46 = vst.msk [vmem:[#allocation2 + $0xf0] sm:$0xff] %vm6294_vm0, %v4949_v1  ;;  %47 = vst.msk [vmem:[#allocation2 + $0xf8] sm:$0xff] %vm6294_vm0, %v4949_v1  ;;  %4451 = vmatpush3.bf16.msra.mxu0 %v4916_v8  ;;  %4324 = vmatprep.subr.bf16.mxu1 %v4917_v14  ;;  %v4921_v46 = vld [vmem:[%s6287_s1 + $0xb0] sm:$0xff]   ;;  %v70_v48 = vld [vmem:[%s6288_s0 + $0x80] sm:$0xff]  ;;  %v122_v8 = vadd.s32 24, %v5117_v47 }
  0x11   :  { %48 = vst.msk [vmem:[#allocation2 + $0x100] sm:$0xff] %vm6294_vm0, %v4949_v1  ;;  %49 = vst.msk [vmem:[#allocation2 + $0x108] sm:$0xff] %vm6294_vm0, %v4949_v1  ;;  %4484 = vmatprep.subr.bf16.mxu0 %v4918_v17  ;;  %v71_v50 = vld [vmem:[%s6288_s0 + $0x88] sm:$0xff]  ;;  %v4923_v52 = vld [vmem:[%s6287_s1 + $0x10] sm:$0xff]  }
  0x12   :  { %50 = vst.msk [vmem:[#allocation2 + $0x110] sm:$0xff] %vm6294_vm0, %v4949_v1  ;;  %51 = vst.msk [vmem:[#allocation2 + $0x118] sm:$0xff] %vm6294_vm0, %v4949_v1  ;;  %v4922_v53 = vld [vmem:[%s6287_s1 + $0xb8] sm:$0xff]   ;;  %v72_v56 = vld [vmem:[%s6288_s0 + $0x90] sm:$0xff] }
  0x13   :  { %52 = vst.msk [vmem:[#allocation2 + $0x120] sm:$0xff] %vm6294_vm0, %v4949_v1  ;;  %53 = vst.msk [vmem:[#allocation2 + $0x128] sm:$0xff] %vm6294_vm0, %v4949_v1  ;;  %v73_v57 = vld [vmem:[%s6288_s0 + $0x98] sm:$0xff]  ;;  %v74_v60 = vld [vmem:[%s6288_s0 + $0xa0] sm:$0xff] }
  0x14   :  { %86 = vst.msk [vmem:[#allocation2 + $0x18] sm:$0xff] %vm6294_vm0, %v54_v11  ;;  %87 = vst.msk [vmem:[#allocation2 + $0x20] sm:$0xff] %vm6294_vm0, %v55_v13  ;;  %v5152_v63 = vld [vmem:[%s6287_s1 + $0xc0] sm:$0xff]   ;;  %v75_v0 = vld [vmem:[%s6288_s0 + $0xa8] sm:$0xff]  ;;  %v124_v11 = vadd.s32 40, %v5117_v47 }
  0x15   :  { %88 = vst.msk [vmem:[#allocation2 + $0x28] sm:$0xff] %vm6294_vm0, %v56_v15  ;;  %89 = vst.msk [vmem:[#allocation2 + $0x30] sm:$0xff] %vm6294_vm0, %v57_v16  ;;  %v76_v1 = vld [vmem:[%s6288_s0 + $0xb0] sm:$0xff]  ;;  %v77_v2 = vld [vmem:[%s6288_s0 + $0xb8] sm:$0xff] }
  0x16   :  { %90 = vst.msk [vmem:[#allocation2 + $0x38] sm:$0xff] %vm6294_vm0, %v58_v18  ;;  %91 = vst.msk [vmem:[#allocation2 + $0x40] sm:$0xff] %vm6294_vm0, %v59_v19  ;;  %v78_v5 = vld [vmem:[%s6288_s0 + $0xc0] sm:$0xff]  ;;  %v79_v6 = vld [vmem:[%s6288_s0 + $0xc8] sm:$0xff]  ;;  %v176_v18 = vand.u32 15, %v122_v8  ;;  %v190_v19 = vand.u32 15, %v124_v11 }
  0x17   :  { %92 = vst.msk [vmem:[#allocation2 + $0x48] sm:$0xff] %vm6294_vm0, %v60_v20  ;;  %93 = vst.msk [vmem:[#allocation2 + $0x50] sm:$0xff] %vm6294_vm0, %v61_v21  ;;  %v4925_v9 = vld [vmem:[%s6287_s1 + $0x18] sm:$0xff]   ;;  %v82_v20 = vld [vmem:[%s6288_s0 + $0xe0] sm:$0xff]  ;;  %v6338_v11 = vmov 0 }
  0x18   :  { %94 = vst.msk [vmem:[#allocation2 + $0x58] sm:$0xff] %vm6294_vm0, %v62_v22  ;;  %95 = vst.msk [vmem:[#allocation2 + $0x60] sm:$0xff] %vm6294_vm0, %v63_v23  ;;  %v81_v15 = vld [vmem:[%s6288_s0 + $0xd8] sm:$0xff]  ;;  %v83_v22 = vld [vmem:[%s6288_s0 + $0xe8] sm:$0xff]  ;;  %vm5214_vm2 = vcmp.le.s32.totalorder %v176_v18, 14  ;;  %vm5221_vm3 = vcmp.le.s32.totalorder %v190_v19, 14 }
  0x19   :  { %96 = vst.msk [vmem:[#allocation2 + $0x68] sm:$0xff] %vm6294_vm0, %v64_v25  ;;  %97 = vst.msk [vmem:[#allocation2 + $0x70] sm:$0xff] %vm6294_vm0, %v65_v26  ;;  %v6323_v25 = vmov 0  ;;  %v4928_v8 = vld [vmem:[%s6287_s1 + $0xd0] sm:$0xff]   ;;  %v6341_v19 = vmov 0 }
  0x1a   :  { %98 = vst.msk [vmem:[#allocation2 + $0x78] sm:$0xff] %vm6294_vm0, %v66_v33  ;;  %99 = vst.msk [vmem:[#allocation2 + $0x80] sm:$0xff] %vm6294_vm0, %v67_v34  ;;  %v6324_v25 = vsel %vm5214_vm2, 4294967295, %v6323_v25 }
  0x1b   :  { %v2046_v24 = vld [vmem:[#allocation2 + $0x18] sm:$0xff]  ;;  %v2047_v27 = vld [vmem:[#allocation2 + $0x20] sm:$0xff]  ;;  %100 = vst.msk [vmem:[#allocation2 + $0x88] sm:$0xff] %vm6294_vm0, %v68_v35  ;;  %101 = vst.msk [vmem:[#allocation2 + $0x90] sm:$0xff] %vm6294_vm0, %v69_v41 }
  0x1c   :  { %v2078_v28 = vpack.c.bf16 %v2047_v27, %v2046_v24  ;;  %v2048_v29 = vld [vmem:[#allocation2 + $0x28] sm:$0xff]  ;;  %v2049_v30 = vld [vmem:[#allocation2 + $0x30] sm:$0xff]  ;;  %102 = vst.msk [vmem:[#allocation2 + $0x98] sm:$0xff] %vm6294_vm0, %v70_v48  ;;  %103 = vst.msk [vmem:[#allocation2 + $0xa0] sm:$0xff] %vm6294_vm0, %v71_v50  ;;  %v126_v24 = vadd.s32 56, %v5117_v47  ;;  %v136_v48 = vadd.s32 136, %v5117_v47 }
  0x1d   :  { %v2079_v32 = vpack.c.bf16 %v2049_v30, %v2048_v29  ;;  %v2050_v37 = vld [vmem:[#allocation2 + $0x38] sm:$0xff]  ;;  %v2051_v38 = vld [vmem:[#allocation2 + $0x40] sm:$0xff]  ;;  %104 = vst.msk [vmem:[#allocation2 + $0xa8] sm:$0xff] %vm6294_vm0, %v72_v56  ;;  %105 = vst.msk [vmem:[#allocation2 + $0xb0] sm:$0xff] %vm6294_vm0, %v73_v57  ;;  %v128_v30 = vadd.s32 72, %v5117_v47  ;;  %v6329_v50 = vmov 0 }
  0x1e   :  { %4452 = vmatprep.mubr.msk.bf16.mxu0 %vm6294_vm0, %v2078_v28  ;;  %4293 = vmatmul.mubr.msk.bf16.vlgmr.msra.gmra.mrb[0].mxu1 %vm6294_vm0, %v2078_v28  ;;  %v2080_v40 = vpack.c.bf16 %v2051_v38, %v2050_v37  ;;  %v2052_v42 = vld [vmem:[#allocation2 + $0x48] sm:$0xff]  ;;  %v2053_v43 = vld [vmem:[#allocation2 + $0x50] sm:$0xff]  ;;  %106 = vst.msk [vmem:[#allocation2 + $0xb8] sm:$0xff] %vm6294_vm0, %v74_v60  ;;  %107 = vst.msk [vmem:[#allocation2 + $0xc0] sm:$0xff] %vm6294_vm0, %v75_v0  ;;  %v6326_v28 = vmov 0  ;;  %v204_v37 = vand.u32 15, %v126_v24 }
  0x1f   :  { %4453 = vmatmul.mubr.msk.bf16.vlgmr.msra.gmra.mrb[0].mxu0 %vm6294_vm0, %v2079_v32  ;;  %4325 = vmatpush3.bf16.msra.mxu1 %v4917_v14  ;;  %v2054_v44 = vld [vmem:[#allocation2 + $0x58] sm:$0xff]  ;;  %v2055_v45 = vld [vmem:[#allocation2 + $0x60] sm:$0xff]  ;;  %v2081_v49 = vpack.c.bf16 %v2053_v43, %v2052_v42  ;;  %108 = vst.msk [vmem:[#allocation2 + $0xc8] sm:$0xff] %vm6294_vm0, %v76_v1  ;;  %109 = vst.msk [vmem:[#allocation2 + $0xd0] sm:$0xff] %vm6294_vm0, %v77_v2  ;;  %v6327_v28 = vsel %vm5221_vm3, 4294967295, %v6326_v28  ;;  %v130_v38 = vadd.s32 88, %v5117_v47 }
  0x20   :  { %4485 = vmatpush3.bf16.msra.mxu0 %v4918_v17  ;;  %4296 = vmatprep.mubr.msk.bf16.mxu1 %vm6294_vm0, %v2079_v32  ;;  %v2082_v51 = vpack.c.bf16 %v2055_v45, %v2054_v44  ;;  %v2056_v55 = vld [vmem:[#allocation2 + $0x68] sm:$0xff]  ;;  %v2057_v58 = vld [vmem:[#allocation2 + $0x70] sm:$0xff]  ;;  %110 = vst.msk [vmem:[#allocation2 + $0xd8] sm:$0xff] %vm6294_vm0, %v78_v5  ;;  %111 = vst.msk [vmem:[#allocation2 + $0xe0] sm:$0xff] %vm6294_vm0, %v79_v6  ;;  %v218_v42 = vand.u32 15, %v128_v30  ;;  %v132_v43 = vadd.s32 104, %v5117_v47 }
  0x21   :  { %4456 = vmatprep.mubr.msk.bf16.mxu0 %vm6294_vm0, %v2080_v40  ;;  %4486 = vmatprep.subr.bf16.mxu0 %v4919_v31  ;;  %v2058_v59 = vld [vmem:[#allocation2 + $0x78] sm:$0xff]  ;;  %v2059_v61 = vld [vmem:[#allocation2 + $0x80] sm:$0xff]  ;;  %v2083_v3 = vpack.c.bf16 %v2057_v58, %v2056_v55  ;;  %v80_v14 = vld [vmem:[%s6288_s0 + $0xd0] sm:$0xff]  ;;  %113 = vst.msk [vmem:[#allocation2 + $0xf0] sm:$0xff] %vm6294_vm0, %v81_v15  ;;  %v134_v44 = vadd.s32 120, %v5117_v47  ;;  %vm5253_vm4 = vcmp.le.s32.totalorder %v204_v37, 14 }
  0x22   :  { %4326 = vmatprep.subr.bf16.mxu1 %v4920_v39  ;;  %v2084_v4 = vpack.c.bf16 %v2059_v61, %v2058_v59  ;;  %v5185_v10 = vld [vmem:[#allocation2 + $0x21] sm:$0xff]  ;;  %v2061_v13 = vld [vmem:[#allocation2 + $0x90] sm:$0xff]  ;;  %v5197_v16 = vld [vmem:[#allocation2 + $0x19] sm:$0xff]  ;;  %112 = vst.msk [vmem:[#allocation2 + $0xe8] sm:$0xff] %vm6294_vm0, %v80_v14  ;;  %v6330_v50 = vsel %vm5253_vm4, 4294967295, %v6329_v50  ;;  %vm5265_vm5 = vcmp.le.s32.totalorder %v218_v42, 14 }
  0x23   :  { %4327 = vmatpush3.bf16.msra.mxu1 %v4920_v39  ;;  %v2060_v12 = vld [vmem:[#allocation2 + $0x88] sm:$0xff]  ;;  %v2401_v17 = vsel %vm5173_vm1, %v5185_v10, 0.0  ;;  %114 = vst.msk [vmem:[#allocation2 + $0xf8] sm:$0xff] %vm6294_vm0, %v82_v20  ;;  %115 = vst.msk [vmem:[#allocation2 + $0x100] sm:$0xff] %vm6294_vm0, %v83_v22  ;;  %v5218_v26 = vld [vmem:[#allocation2 + $0x31] sm:$0xff]  ;;  %v6332_v55 = vmov 0 }
  0x24   :  { %4487 = vmatpush3.bf16.msra.mxu0 %v4919_v31  ;;  %4328 = vmatprep.subr.bf16.mxu1 %v4923_v52  ;;  %v2085_v21 = vpack.c.bf16 %v2061_v13, %v2060_v12  ;;  %v2432_v23 = vpack.c.bf16 %v2401_v17, %v5197_v16  ;;  %6325 = vst [vmem:[#allocation3_spill] sm:$0xff] %v6324_v25  ;;  %v769_v27 = vld [vmem:[#allocation2 + $0x98] sm:$0xff]  ;;  %6328 = vst [vmem:[#allocation4_spill] sm:$0xff] %v6327_v28  ;;  %v5225_v29 = vld [vmem:[#allocation2 + $0x41] sm:$0xff]  ;;  %v2403_v34 = vsel %vm5214_vm2, %v5218_v26, 0.0  ;;  %v6346_v24 = vmov 0 }
  0x25   :  { %4488 = vmatprep.subr.bf16.mxu0 %v4921_v46  ;;  %v770_v31 = vld [vmem:[#allocation2 + $0xa0] sm:$0xff]  ;;  %v5236_v33 = vld [vmem:[#allocation2 + $0x29] sm:$0xff]  ;;  %6331 = vst [vmem:[#allocation5_spill] sm:$0xff] %v6330_v50  ;;  %v6333_v55 = vsel %vm5265_vm5, 4294967295, %v6332_v55  ;;  %v246_v57 = vand.u32 15, %v132_v43  ;;  %v260_v58 = vand.u32 15, %v134_v44 }
  0x26   :  { %4297 = vmatmul.mubr.msk.bf16.gmra.mrb[4].mxu1 %vm6294_vm0, %v2080_v40  ;;  %v5233_v32 = vld [vmem:[%s6287_s1 + $0x40] sm:$0xff]   ;;  %v771_v35 = vld [vmem:[#allocation2 + $0xa8] sm:$0xff]  ;;  %v772_v36 = vld [vmem:[#allocation2 + $0xb0] sm:$0xff]  ;;  %v2405_v40 = vsel %vm5221_vm3, %v5225_v29, 0.0  ;;  %v792_v41 = vpack.c.bf16 %v770_v31, %v769_v27  ;;  %v2433_v45 = vpack.c.bf16 %v2403_v34, %v5236_v33  ;;  %6334 = vst [vmem:[#allocation6_spill] sm:$0xff] %v6333_v55  ;;  %v155_v59 = vand.u32 15, %v5117_v47 }
  0x27   :  { %4457 = vmatmul.mubr.msk.bf16.gmra.mrb[4].mxu0 %vm6294_vm0, %v2081_v49  ;;  %4300 = vmatprep.mubr.msk.bf16.mxu1 %vm6294_vm0, %v2081_v49  ;;  %v5242_v39 = vld [vmem:[#allocation2 + $0x39] sm:$0xff]  ;;  %v5263_v54 = vld [vmem:[#allocation2 + $0x49] sm:$0xff]  ;;  %v5269_v56 = vld [vmem:[#allocation2 + $0x61] sm:$0xff]  ;;  %v274_v0 = vand.u32 15, %v136_v48  ;;  %v121_v1 = vadd.s32 16, %v5117_v47  ;;  %v138_v5 = vadd.s32 152, %v5117_v47 }
  0x28   :  { %4460 = vmatprep.mubr.msk.bf16.mxu0 %vm6294_vm0, %v2082_v51  ;;  %4489 = vmatpush3.bf16.msra.mxu0 %v4921_v46  ;;  %v793_v46 = vpack.c.bf16 %v772_v36, %v771_v35  ;;  %v2434_v49 = vpack.c.bf16 %v2405_v40, %v5242_v39  ;;  %v773_v60 = vld [vmem:[#allocation2 + $0xb8] sm:$0xff]  ;;  %v774_v61 = vld [vmem:[#allocation2 + $0xc0] sm:$0xff]  ;;  %v2409_v6 = vsel %vm5265_vm5, %v5269_v56, 0.0  ;;  %vm5293_vm7 = vcmp.le.s32.totalorder %v246_v57, 14  ;;  %v84_v12 = vld [vmem:[%s6288_s0 + $0xf0] sm:$0xff] }
  0x29   :  { %4490 = vmatprep.subr.bf16.mxu0 %v4922_v53  ;;  %4329 = vmatpush3.bf16.msra.mxu1 %v4923_v52  ;;  %v232_v52 = vand.u32 15, %v130_v38  ;;  %v5274_v62 = vld [vmem:[#allocation2 + $0x59] sm:$0xff]  ;;  %v6339_v11 = vsel %vm5293_vm7, 4294967295, %v6338_v11  ;;  %v123_v15 = vadd.s32 32, %v5117_v47  ;;  %116 = vst.msk [vmem:[#allocation2 + $0x108] sm:$0xff] %vm6294_vm0, %v84_v12  ;;  %v1373_v17 = vsel %vm5214_vm2, %v5185_v10, 0.0 }
  0x2a   :  { %4330 = vmatprep.subr.bf16.mxu1 %v4925_v9  ;;  %6340 = vst [vmem:[#allocation8_spill] sm:$0xff] %v6339_v11  ;;  %v2436_v18 = vpack.c.bf16 %v2409_v6, %v5274_v62  ;;  %vm5307_vm8 = vcmp.le.s32.totalorder %v260_v58, 14  ;;  %vm5311_vm9 = vcmp.ge.s32.totalorder %v155_v59, 1  ;;  %v5317_v22 = vadd.s32 48, %v5117_v47  ;;  %v85_v10 = vld [vmem:[%s6288_s0 + $0xf8] sm:$0xff]  ;;  %v5333_v34 = vld [vmem:[#allocation2 + $0x81] sm:$0xff] }
  0x2b   :  { %vm5289_vm6 = vcmp.le.s32.totalorder %v232_v52, 14  ;;  %v6342_v19 = vsel %vm5307_vm8, 4294967295, %v6341_v19  ;;  %vm5324_vm10 = vcmp.le.s32.totalorder %v274_v0, 14  ;;  %v169_v27 = vand.u32 15, %v121_v1  ;;  %v4930_v31 = vld [vmem:[%s6287_s1 + $0xd8] sm:$0xff]   ;;  %117 = vst.msk [vmem:[#allocation2 + $0x110] sm:$0xff] %vm6294_vm0, %v85_v10 }
  0x2c   :  { %4491 = vmatpush3.bf16.msra.mxu0 %v4922_v53  ;;  %v4926_v53 = vld [vmem:[%s6287_s1 + $0xc8] sm:$0xff]   ;;  %6343 = vst [vmem:[#allocation9_spill] sm:$0xff] %v6342_v19  ;;  %v6347_v24 = vsel %vm5324_vm10, 4294967295, %v6346_v24  ;;  %v288_v30 = vand.u32 15, %v138_v5  ;;  %v142_v35 = vadd.s32 184, %v5117_v47  ;;  %v5337_v36 = vpack.c.bf16 %v1373_v17, %v5197_v16  ;;  %v777_v37 = vld [vmem:[#allocation2 + $0xd8] sm:$0xff] }
  0x2d   :  { %4524 = vmatprep.subr.bf16.mxu0 %v5152_v63  ;;  %4331 = vmatpush3.bf16.msra.mxu1 %v4925_v9  ;;  %v6335_v9 = vmov 0  ;;  %6348 = vst [vmem:[#allocation10_spill] sm:$0xff] %v6347_v24  ;;  %v778_v38 = vld [vmem:[#allocation2 + $0xe0] sm:$0xff]  ;;  %v183_v40 = vand.u32 15, %v123_v15  ;;  %v5343_v42 = vld [vmem:[#allocation2 + $0x69] sm:$0xff]  ;;  %vm5356_vm11 = vcmp.ge.s32.totalorder %v169_v27, 1 }
  0x2e   :  { %4301 = vmatmul.mubr.msk.bf16.gmra.mrb[8].mxu1 %vm6294_vm0, %v2082_v51  ;;  %4364 = vmatprep.subr.bf16.mxu1 %v5233_v32  ;;  %v5257_v51 = vld [vmem:[#allocation2 + $0x51] sm:$0xff]  ;;  %v6336_v9 = vsel %vm5289_vm6, 4294967295, %v6335_v9  ;;  %v779_v44 = vld [vmem:[#allocation2 + $0xe8] sm:$0xff]  ;;  %v5351_v48 = vld [vmem:[#allocation2 + $0x79] sm:$0xff]  ;;  %v146_v57 = vadd.s32 216, %v5117_v47  ;;  %v148_v58 = vadd.s32 232, %v5117_v47  ;;  %v796_v59 = vpack.c.bf16 %v778_v38, %v777_v37 }
  0x2f   :  { %4461 = vmatmul.mubr.msk.bf16.gmra.mrb[8].mxu0 %vm6294_vm0, %v2083_v3  ;;  %4304 = vmatprep.mubr.msk.bf16.mxu1 %vm6294_vm0, %v2083_v3  ;;  %v2407_v2 = vsel %vm5253_vm4, %v5257_v51, 0.0  ;;  %v775_v3 = vld [vmem:[#allocation2 + $0xc8] sm:$0xff]  ;;  %6337 = vst [vmem:[#allocation7_spill] sm:$0xff] %v6336_v9  ;;  %v780_v16 = vld [vmem:[#allocation2 + $0xf0] sm:$0xff]  ;;  %vm5370_vm12 = vcmp.le.s32.totalorder %v288_v30, 14  ;;  %v316_v0 = vand.u32 15, %v142_v35 }
  0x30   :  { %4464 = vmatprep.mubr.msk.bf16.mxu0 %vm6294_vm0, %v2084_v4  ;;  %v2435_v13 = vpack.c.bf16 %v2407_v2, %v5263_v54  ;;  %v150_v1 = vadd.s32 248, %v5117_v47  ;;  %vm5381_vm13 = vcmp.ge.s32.totalorder %v183_v40, 1  ;;  %v2385_v15 = vld [vmem:[#allocation2 + $0xa1] sm:$0xff]  ;;  %v6356_v17 = vmov 0  ;;  %v781_v10 = vld [vmem:[#allocation2 + $0xf8] sm:$0xff]  ;;  %v2382_v27 = vld [vmem:[#allocation2 + $0x89] sm:$0xff] }
  0x31   :  { %v600_v30 = vld [vmem:[#allocation2 + $0xf] sm:$0xff]  ;;  %vm5403_vm15 = vcmp.le.s32.totalorder %v316_v0, 14  ;;  %v1379_v37 = vsel %vm5265_vm5, %v5257_v51, 0.0  ;;  %v6362_v40 = vmov 0  ;;  %v2417_v51 = vsel %vm5324_vm10, %v2385_v15, 0.0  ;;  %v5747_v12 = vld [vmem:[#allocation2 + $0xb7] sm:$0xff] }
  0x32   :  { %v372_v35 = vand.u32 15, %v150_v1  ;;  %v2399_v55 = vld [vmem:[#allocation2 + $0x111] sm:$0xff]  ;;  %v5842_v9 = vld [vmem:[%s6287_s1 + $0x100] sm:$0xff]   ;;  %v3402_v7 = vld [vmem:[#allocation2 + $0x49] sm:$0xff] }
  0x33   :  { %v4939_v20 = vld [vmem:[%s6287_s1 + $0x70] sm:$0xff]  }
  0x36   :  { %4305 = vmatmul.mubr.msk.bf16.gmra.mrb[12].mxu1 %vm6294_vm0, %v2084_v4  ;;  %v776_v4 = vld [vmem:[#allocation2 + $0xd0] sm:$0xff] }
  0x37   :  { %4465 = vmatmul.mubr.msk.bf16.gmra.mrb[12].mxu0 %vm6294_vm0, %v2085_v21  ;;  %4308 = vmatprep.mubr.msk.bf16.mxu1 %vm6294_vm0, %v2085_v21  ;;  %v795_v14 = vpack.c.bf16 %v776_v4, %v775_v3  ;;  %v140_v21 = vadd.s32 168, %v5117_v47  ;;  %v797_v3 = vpack.c.bf16 %v780_v16, %v779_v44  ;;  %v2383_v4 = vld [vmem:[#allocation2 + $0x91] sm:$0xff]  ;;  %v6365_v16 = vmov 0 }
  0x38   :  { %4492 = vmatprep.mubr.msk.bf16.mxu0 %vm6294_vm0, %v2432_v23  ;;  %v5322_v23 = vld [vmem:[#allocation2 + $0x71] sm:$0xff] }
  0x39   :  { %v2411_v43 = vsel %vm5289_vm6, %v5322_v23, 0.0  ;;  %v601_v44 = vld [vmem:[#allocation2 + $0x17] sm:$0xff] }
  0x3a   :  { %v2437_v2 = vpack.c.bf16 %v2411_v43, %v5343_v42  ;;  %v2384_v43 = vld [vmem:[#allocation2 + $0x99] sm:$0xff] }
  0x3b   :  { %v2440_v1 = vpack.c.bf16 %v2417_v51, %v2384_v43 }
  0x3e   :  { %4309 = vmatmul.mubr.msk.bf16.gmra.mrb[16].mxu1 %vm6294_vm0, %v792_v41  ;;  %v144_v41 = vadd.s32 200, %v5117_v47 }
  0x3f   :  { %4493 = vmatmul.mubr.msk.bf16.vlgmr.msra.gmra.mrb[0].mxu0 %vm6294_vm0, %v2433_v45  ;;  %4312 = vmatprep.mubr.msk.bf16.mxu1 %vm6294_vm0, %v793_v46  ;;  %v302_v45 = vand.u32 15, %v140_v21  ;;  %v1375_v46 = vsel %vm5221_vm3, %v5218_v26, 0.0  ;;  %v5368_v26 = vld [vmem:[%s6287_s1 + $0xe0] sm:$0xff]   ;;  %v358_v21 = vand.u32 15, %v148_v58  ;;  %v6371_v58 = vmov 0 }
  0x40   :  { %4525 = vmatpush3.bf16.msra.mxu0 %v5152_v63  ;;  %4496 = vmatprep.mubr.msk.bf16.mxu0 %vm6294_vm0, %v2434_v49  ;;  %v794_v63 = vpack.c.bf16 %v774_v61, %v773_v60  ;;  %v2413_v49 = vsel %vm5293_vm7, %v5333_v34, 0.0  ;;  %v6351_v60 = vmov 0  ;;  %v197_v61 = vand.u32 15, %v5317_v22 }
  0x41   :  { %4526 = vmatprep.subr.bf16.mxu0 %v4926_v53  ;;  %v6352_v60 = vsel %vm5370_vm12, 4294967295, %v6351_v60  ;;  %v330_v5 = vand.u32 15, %v144_v41  ;;  %v5378_v6 = vpack.c.bf16 %v1375_v46, %v5236_v33  ;;  %vm5391_vm14 = vcmp.le.s32.totalorder %v302_v45, 14 }
  0x42   :  { %6353 = vst [vmem:[#allocation11_spill] sm:$0xff] %v6352_v60  ;;  %v6357_v17 = vsel %vm5391_vm14, 4294967295, %v6356_v17  ;;  %v5419_v41 = vpack.c.bf16 %v1379_v37, %v5263_v54  ;;  %vm5428_vm3 = vcmp.le.s32.totalorder %v358_v21, 14  ;;  %v6368_v45 = vmov 0  ;;  %v2388_v21 = vld [vmem:[#allocation2 + $0xb9] sm:$0xff] }
  0x43   :  { %6358 = vst [vmem:[#allocation12_spill] sm:$0xff] %v6357_v17  ;;  %v6369_v45 = vsel %vm5428_vm3, 4294967295, %v6368_v45  ;;  %v1381_v54 = vsel %vm5289_vm6, %v5269_v56, 0.0  ;;  %v1385_v56 = vsel %vm5307_vm8, %v5333_v34, 0.0  ;;  %vm5452_vm6 = vcmp.ge.s32.totalorder %v197_v61, 1 }
  0x44   :  { %4527 = vmatpush3.bf16.msra.mxu0 %v4926_v53  ;;  %v5361_v53 = vadd.s32 64, %v5117_v47  ;;  %6370 = vst [vmem:[#allocation16_spill] sm:$0xff] %v6369_v45  ;;  %v1389_v61 = vsel %vm5370_vm12, %v2385_v15, 0.0  ;;  %v5648_v45 = vld [vmem:[#allocation2 + $0x77] sm:$0xff] }
  0x45   :  { %4528 = vmatprep.subr.bf16.mxu0 %v4928_v8 }
  0x46   :  { %4313 = vmatmul.mubr.msk.bf16.gmra.mrb[20].mxu1 %vm6294_vm0, %v794_v63  ;;  %v599_v63 = vld [vmem:[#allocation2 + $0x7] sm:$0xff] }
  0x47   :  { %4497 = vmatmul.mubr.msk.bf16.gmra.mrb[4].mxu0 %vm6294_vm0, %v2435_v13  ;;  %4316 = vmatprep.mubr.msk.bf16.mxu1 %vm6294_vm0, %v795_v14  ;;  %v5386_v13 = vadd.s32 80, %v5117_v47  ;;  %v1377_v14 = vsel %vm5253_vm4, %v5225_v29, 0.0  ;;  %v2415_v29 = vsel %vm5307_vm8, %v2383_v4, 0.0  ;;  %v695_v38 = vsel %vm5311_vm9, %v599_v63, 0.0 }
  0x48   :  { %4500 = vmatprep.mubr.msk.bf16.mxu0 %vm6294_vm0, %v2436_v18  ;;  %4529 = vmatpush3.bf16.msra.mxu0 %v4928_v8  ;;  %v2438_v8 = vpack.c.bf16 %v2413_v49, %v5351_v48  ;;  %v344_v18 = vand.u32 15, %v146_v57  ;;  %v5398_v22 = vpack.c.bf16 %v1377_v14, %v5242_v39  ;;  %v782_v39 = vld [vmem:[#allocation2 + $0x100] sm:$0xff]  ;;  %vm5414_vm4 = vcmp.le.s32.totalorder %v330_v5, 14  ;;  %v2387_v57 = vld [vmem:[#allocation2 + $0xb1] sm:$0xff] }
  0x49   :  { %4530 = vmatprep.subr.bf16.mxu0 %v4930_v31  ;;  %v6363_v40 = vsel %vm5414_vm4, 4294967295, %v6362_v40  ;;  %v798_v46 = vpack.c.bf16 %v782_v39, %v781_v10  ;;  %v2439_v49 = vpack.c.bf16 %v2415_v29, %v2382_v27  ;;  %v727_v0 = vpack.c.bf16 %v600_v30, %v695_v38  ;;  %v2389_v10 = vld [vmem:[#allocation2 + $0xc1] sm:$0xff]  ;;  %v2390_v39 = vld [vmem:[#allocation2 + $0xc9] sm:$0xff]  ;;  %v2392_v38 = vld [vmem:[#allocation2 + $0xd9] sm:$0xff] }
  0x4a   :  { %6364 = vst [vmem:[#allocation14_spill] sm:$0xff] %v6363_v40  ;;  %vm5424_vm5 = vcmp.le.s32.totalorder %v344_v18, 14  ;;  %v697_v5 = vsel %vm5356_vm11, %v601_v44, 0.0  ;;  %v5460_v14 = vpack.c.bf16 %v1385_v56, %v5351_v48  ;;  %v602_v18 = vld [vmem:[#allocation2 + $0x1f] sm:$0xff]  ;;  %v2419_v34 = vsel %vm5370_vm12, %v2387_v57, 0.0  ;;  %v2391_v48 = vld [vmem:[#allocation2 + $0xd1] sm:$0xff] }
  0x4b   :  { %v6366_v16 = vsel %vm5424_vm5, 4294967295, %v6365_v16  ;;  %vm6376_vm8 = vcmask 523264   ;;  %v5474_v30 = vld [vmem:[#allocation2 + $0xe1] sm:$0xff]  ;;  %v1393_v37 = vsel %vm5403_vm15, %v2389_v10, 0.0  ;;  %v5590_v40 = vld [vmem:[#allocation2 + $0x57] sm:$0xff] }
  0x4c   :  { %4531 = vmatpush3.bf16.msra.mxu0 %v4930_v31  ;;  %v6359_v31 = vmov 0  ;;  %6367 = vst [vmem:[#allocation15_spill] sm:$0xff] %v6366_v16  ;;  %v5491_v51 = vpack.c.bf16 %v1393_v37, %v2388_v21  ;;  %v137_v16 = vadd.s32 144, %v5117_v47 }
  0x4d   :  { %4564 = vmatprep.subr.bf16.mxu0 %v5368_v26  ;;  %v6360_v31 = vsel %vm5403_vm15, 4294967295, %v6359_v31 }
  0x4e   :  { %4317 = vmatmul.mubr.msk.bf16.gmra.mrb[24].mxu1 %vm6294_vm0, %v796_v59  ;;  %6361 = vst [vmem:[#allocation13_spill] sm:$0xff] %v6360_v31  ;;  %v5440_v59 = vpack.c.bf16 %v1381_v54, %v5274_v62  ;;  %v1395_v54 = vsel %vm5414_vm4, %v2391_v48, 0.0 }
  0x4f   :  { %4501 = vmatmul.mubr.msk.bf16.gmra.mrb[8].mxu0 %vm6294_vm0, %v2437_v2  ;;  %4320 = vmatprep.mubr.msk.bf16.mxu1 %vm6294_vm0, %v797_v3  ;;  %v5442_v2 = vld [vmem:[#allocation2 + $0x27] sm:$0xff]  ;;  %v1383_v3 = vsel %vm5293_vm7, %v5322_v23, 0.0  ;;  %v1387_v23 = vsel %vm5324_vm10, %v2383_v4, 0.0  ;;  %v5476_v4 = vpack.c.bf16 %v1389_v61, %v2384_v43  ;;  %vm6377_vm10 = vmmov %vm6376_vm8  ;;  %v728_v61 = vpack.c.bf16 %v602_v18, %v697_v5 }
  0x50   :  { %4504 = vmatprep.mubr.msk.bf16.mxu0 %vm6294_vm0, %v2438_v8  ;;  %vm5435_vm0 = vcmp.le.s32.totalorder %v372_v35, 14  ;;  %v2386_v8 = vld [vmem:[#allocation2 + $0xa9] sm:$0xff]  ;;  %v5457_v62 = vpack.c.bf16 %v1383_v3, %v5343_v42  ;;  %v5466_v29 = vpack.c.bf16 %v1387_v23, %v2382_v27  ;;  %v699_v42 = vsel %vm5381_vm13, %v5442_v2, 0.0  ;;  %vm6378_vm7 = vmmov %vm6376_vm8  ;;  %v5482_v27 = vld [vmem:[#allocation2 + $0xf1] sm:$0xff] }
  0x51   :  { %v6372_v58 = vsel %vm5435_vm0, 4294967295, %v6371_v58  ;;  %v1391_v35 = vsel %vm5391_vm14, %v2387_v57, 0.0  ;;  %v5489_v43 = vld [vmem:[#allocation2 + $0xe9] sm:$0xff]  ;;  %v5507_v3 = vpack.c.bf16 %v1395_v54, %v2390_v39  ;;  %v2441_v33 = vpack.c.bf16 %v2419_v34, %v2386_v8 }
  0x52   :  { %6373 = vst [vmem:[#allocation17_spill] sm:$0xff] %v6372_v58  ;;  %v5484_v15 = vpack.c.bf16 %v1391_v35, %v2386_v8  ;;  %v5501_v57 = vld [vmem:[#allocation2 + $0x2f] sm:$0xff]  ;;  %v5514_v35 = vld [vmem:[#allocation2 + $0xf9] sm:$0xff]  ;;  %v1726_v54 = vsel %vm5356_vm11, %v5442_v2, 0.0  ;;  %v6380_v8 = vand.u32 15, %v5361_v53 }
  0x53   :  { %v5533_v24 = vpack.c.bf16 %v5501_v57, %v1726_v54 }
  0x56   :  { %4321 = vmatmul.mubr.msk.bf16.gmra.mrb[28].mxu1 %vm6376_vm8, %v798_v46  ;;  %vm6379_vm8 = vmmov %vm6378_vm7  ;;  %v1397_v46 = vsel %vm5424_vm5, %v5474_v30, 0.0 }
  0x57   :  { %4505 = vmatmul.mubr.msk.bf16.gmra.mrb[12].mxu0 %vm6377_vm10, %v2439_v49  ;;  %4332 = vmatprep.mubr.msk.bf16.mxu1 %vm6378_vm7, %v727_v0  ;;  %v1399_v49 = vsel %vm5428_vm3, %v5482_v27, 0.0  ;;  %v2421_v0 = vsel %vm5391_vm14, %v2389_v10, 0.0  ;;  %v5509_v56 = vpack.c.bf16 %v1397_v46, %v2392_v38  ;;  %v1724_v10 = vsel %vm5311_vm9, %v601_v44, 0.0  ;;  %v5541_v44 = vld [vmem:[#allocation2 + $0x47] sm:$0xff]  ;;  %vm6383_vm10 = vmmov %vm6379_vm8 }
  0x58   :  { %4508 = vmatprep.mubr.msk.bf16.mxu0 %vm6379_vm8, %v2440_v1  ;;  %v5505_v1 = vld [vmem:[#allocation2 + $0x101] sm:$0xff]  ;;  %v5512_v23 = vpack.c.bf16 %v1399_v49, %v5489_v43  ;;  %v729_v46 = vpack.c.bf16 %v5501_v57, %v699_v42  ;;  %v2442_v5 = vpack.c.bf16 %v2421_v0, %v2388_v21  ;;  %v5528_v49 = vld [vmem:[#allocation2 + $0x37] sm:$0xff]  ;;  %v5530_v60 = vpack.c.bf16 %v602_v18, %v1724_v10  ;;  %vm6384_vm14 = vmmov %vm6379_vm8 }
  0x59   :  { %v1401_v37 = vsel %vm5435_vm0, %v5505_v1, 0.0  ;;  %vm5537_vm7 = vcmp.ge.s32.totalorder %v6380_v8, 1  ;;  %v4929_v42 = vld [vmem:[%s6287_s1 + $0x48] sm:$0xff]   ;;  %v131_v21 = vadd.s32 96, %v5117_v47  ;;  %v5548_v18 = vld [vmem:[#allocation2 + $0x3f] sm:$0xff]  ;;  %v225_v0 = vand.u32 15, %v5386_v13  ;;  %vm6385_vm12 = vmmov %vm6379_vm8 }
  0x5a   :  { %v5520_v17 = vpack.c.bf16 %v1401_v37, %v5514_v35  ;;  %v701_v53 = vsel %vm5452_vm6, %v5528_v49, 0.0  ;;  %v1728_v37 = vsel %vm5381_vm13, %v5528_v49, 0.0  ;;  %v5563_v13 = vld [vmem:[#allocation2 + $0x4f] sm:$0xff]  ;;  %v1730_v54 = vsel %vm5452_vm6, %v5541_v44, 0.0 }
  0x5b   :  { %v5572_v10 = vpack.c.bf16 %v5548_v18, %v1728_v37  ;;  %v730_v8 = vpack.c.bf16 %v5548_v18, %v701_v53  ;;  %v133_v37 = vadd.s32 112, %v5117_v47 }
  0x5d   :  { %v253_v53 = vand.u32 15, %v133_v37 }
  0x5e   :  { %4333 = vmatmul.mubr.msk.bf16.vlgmr.msra.gmra.mrb[0].mxu1 %vm6383_vm10, %v728_v61  ;;  %v2423_v61 = vsel %vm5403_vm15, %v2391_v48, 0.0  ;;  %v2425_v48 = vsel %vm5414_vm4, %v5474_v30, 0.0  ;;  %vm6390_vm10 = vmmov %vm6379_vm8  ;;  %v629_v30 = vld [vmem:[#allocation2 + $0xf7] sm:$0xff] }
  0x5f   :  { %4509 = vmatmul.mubr.msk.bf16.gmra.mrb[16].mxu0 %vm6379_vm8, %v2441_v33  ;;  %4365 = vmatpush3.bf16.msra.mxu1 %v5233_v32  ;;  %v703_v32 = vsel %vm5537_vm7, %v5541_v44, 0.0  ;;  %v4931_v33 = vld [vmem:[%s6287_s1 + $0x50] sm:$0xff]   ;;  %v2443_v31 = vpack.c.bf16 %v2423_v61, %v2390_v39  ;;  %v2444_v11 = vpack.c.bf16 %v2425_v48, %v2392_v38  ;;  %v135_v39 = vadd.s32 128, %v5117_v47  ;;  %vm6391_vm4 = vmmov %vm6379_vm8  ;;  %v5605_v38 = vld [vmem:[#allocation2 + $0x5f] sm:$0xff] }
  0x60   :  { %4336 = vmatprep.mubr.msk.bf16.mxu1 %vm6384_vm14, %v729_v46  ;;  %4512 = vmatprep.mubr.msk.bf16.mxu0 %vm6385_vm12, %v2442_v5  ;;  %v239_v46 = vand.u32 15, %v131_v21  ;;  %v5581_v5 = vpack.c.bf16 %v5563_v13, %v1730_v54  ;;  %v731_v19 = vpack.c.bf16 %v5563_v13, %v703_v32  ;;  %vm5586_vm12 = vcmp.ge.s32.totalorder %v225_v0, 1  ;;  %v5596_v21 = vld [vmem:[#allocation2 + $0x67] sm:$0xff]  ;;  %vm6392_vm15 = vmmov %vm6391_vm4 }
  0x61   :  { %4366 = vmatprep.subr.bf16.mxu1 %v4929_v42  ;;  %v705_v0 = vsel %vm5586_vm12, %v5590_v40, 0.0  ;;  %v1732_v61 = vsel %vm5537_vm7, %v5590_v40, 0.0  ;;  %v2427_v32 = vsel %vm5424_vm5, %v5482_v27, 0.0  ;;  %v1734_v48 = vsel %vm5586_vm12, %v5596_v21, 0.0  ;;  %v5634_v27 = vld [vmem:[%s6287_s1 + $0x60] sm:$0xff]  }
  0x62   :  { %vm5592_vm14 = vcmp.ge.s32.totalorder %v239_v46, 1  ;;  %v5623_v54 = vpack.c.bf16 %v5605_v38, %v1732_v61  ;;  %v267_v46 = vand.u32 15, %v135_v39  ;;  %v2445_v37 = vpack.c.bf16 %v2427_v32, %v5489_v43 }
  0x63   :  { %4367 = vmatpush3.bf16.msra.mxu1 %v4929_v42  ;;  %v4933_v42 = vld [vmem:[%s6287_s1 + $0x58] sm:$0xff]   ;;  %v139_v43 = vadd.s32 160, %v5117_v47  ;;  %v1736_v32 = vsel %vm5592_vm14, %v5648_v45, 0.0 }
  0x64   :  { %4368 = vmatprep.subr.bf16.mxu1 %v4931_v33 }
  0x66   :  { %4337 = vmatmul.mubr.msk.bf16.gmra.mrb[4].mxu1 %vm6390_vm10, %v730_v8  ;;  %v732_v8 = vpack.c.bf16 %v5605_v38, %v705_v0  ;;  %v5654_v0 = vld [vmem:[#allocation2 + $0x87] sm:$0xff]  ;;  %vm6398_vm10 = vmmov %vm6379_vm8 }
  0x67   :  { %4513 = vmatmul.mubr.msk.bf16.gmra.mrb[20].mxu0 %vm6379_vm8, %v2443_v31  ;;  %4340 = vmatprep.mubr.msk.bf16.mxu1 %vm6391_vm4, %v731_v19  ;;  %v5617_v31 = vld [vmem:[#allocation2 + $0x6f] sm:$0xff]  ;;  %v707_v19 = vsel %vm5592_vm14, %v5596_v21, 0.0  ;;  %vm5644_vm4 = vcmp.ge.s32.totalorder %v253_v53, 1  ;;  %v281_v53 = vand.u32 15, %v137_v16 }
  0x68   :  { %4516 = vmatprep.mubr.msk.bf16.mxu0 %vm6392_vm15, %v2444_v11  ;;  %4369 = vmatpush3.bf16.msra.mxu1 %v4931_v33  ;;  %v2429_v11 = vsel %vm5428_vm3, %v5505_v1, 0.0  ;;  %v5637_v33 = vpack.c.bf16 %v5617_v31, %v1734_v48  ;;  %v733_v61 = vpack.c.bf16 %v5617_v31, %v707_v19  ;;  %vm5650_vm15 = vcmp.ge.s32.totalorder %v267_v46, 1  ;;  %vm6399_vm3 = vmmov %vm6379_vm8  ;;  %v2398_v19 = vld [vmem:[#allocation2 + $0x109] sm:$0xff] }
  0x69   :  { %4370 = vmatprep.subr.bf16.mxu1 %v4933_v42  ;;  %v2446_v1 = vpack.c.bf16 %v2429_v11, %v5514_v35  ;;  %v5661_v35 = vld [vmem:[#allocation2 + $0x7f] sm:$0xff]  ;;  %vm6400_vm5 = vmmov %vm6399_vm3  ;;  %v2431_v11 = vsel %vm5435_vm0, %v2399_v55, 0.0  ;;  %v5672_v46 = vld [vmem:[#allocation2 + $0x8f] sm:$0xff]  ;;  %v1738_v16 = vsel %vm5644_vm4, %v5654_v0, 0.0 }
  0x6a   :  { %6393 = vst [vmem:[#allocation18_spill] sm:$0xff] %v5637_v33  ;;  %v5687_v55 = vpack.c.bf16 %v5672_v46, %v1738_v16  ;;  %v2447_v50 = vpack.c.bf16 %v2431_v11, %v2398_v19  ;;  %v5697_v33 = vld [vmem:[#allocation2 + $0x97] sm:$0xff]  ;;  %vm6408_vm0 = vmmov %vm6379_vm8 }
  0x6b   :  { %v1740_v19 = vsel %vm5650_vm15, %v5697_v33, 0.0 }
  0x6c   :  { %4371 = vmatpush3.bf16.msra.mxu1 %v4933_v42  ;;  %v709_v42 = vsel %vm5644_vm4, %v5648_v45, 0.0 }
  0x6d   :  { %4404 = vmatprep.subr.bf16.mxu1 %v5634_v27  ;;  %v734_v58 = vpack.c.bf16 %v5661_v35, %v709_v42 }
  0x6e   :  { %4341 = vmatmul.mubr.msk.bf16.gmra.mrb[8].mxu1 %vm6398_vm10, %v732_v8  ;;  %v711_v8 = vsel %vm5650_vm15, %v5654_v0, 0.0  ;;  %vm6407_vm10 = vmmov %vm6379_vm8 }
  0x6f   :  { %4517 = vmatmul.mubr.msk.bf16.gmra.mrb[24].mxu0 %vm6379_vm8, %v2445_v37  ;;  %4344 = vmatprep.mubr.msk.bf16.mxu1 %vm6399_vm3, %v733_v61  ;;  %v5678_v37 = vpack.c.bf16 %v5661_v35, %v1736_v32  ;;  %v2754_v61 = vsel %vm5311_vm9, %v5442_v2, 0.0  ;;  %v735_v28 = vpack.c.bf16 %v5672_v46, %v711_v8  ;;  %v141_v32 = vadd.s32 176, %v5117_v47  ;;  %v5703_v2 = vld [vmem:[#allocation2 + $0xa7] sm:$0xff]  ;;  %vm6406_vm9 = vmmov %vm6379_vm8 }
  0x70   :  { %4520 = vmatprep.mubr.msk.bf16.mxu0 %vm6400_vm5, %v2446_v1  ;;  %v295_v1 = vand.u32 15, %v139_v43  ;;  %v2786_v25 = vpack.c.bf16 %v5501_v57, %v2754_v61  ;;  %vm5693_vm3 = vcmp.ge.s32.totalorder %v281_v53, 1  ;;  %v143_v43 = vadd.s32 192, %v5117_v47  ;;  %v5709_v57 = vld [vmem:[#allocation2 + $0x9f] sm:$0xff] }
  0x71   :  { %6401 = vst [vmem:[#allocation19_spill] sm:$0xff] %v5678_v37  ;;  %v713_v42 = vsel %vm5693_vm3, %v5697_v33, 0.0  ;;  %v309_v53 = vand.u32 15, %v141_v32  ;;  %v5727_v11 = vpack.c.bf16 %v5709_v57, %v1740_v19  ;;  %v1742_v8 = vsel %vm5693_vm3, %v5703_v2, 0.0 }
  0x72   :  { %vm5699_vm5 = vcmp.ge.s32.totalorder %v295_v1, 1  ;;  %v323_v16 = vand.u32 15, %v143_v43  ;;  %v145_v32 = vadd.s32 208, %v5117_v47  ;;  %v5753_v43 = vld [vmem:[#allocation2 + $0xc7] sm:$0xff]  ;;  %v2772_v48 = vsel %vm5693_vm3, %v5747_v12, 0.0 }
  0x73   :  { %6409 = vst [vmem:[#allocation20_spill] sm:$0xff] %v5727_v11 }
  0x76   :  { %4345 = vmatmul.mubr.msk.bf16.gmra.mrb[12].mxu1 %vm6406_vm9, %v734_v58  ;;  %v2756_v58 = vsel %vm5356_vm11, %v5528_v49, 0.0  ;;  %v736_v49 = vpack.c.bf16 %v5709_v57, %v713_v42  ;;  %vm5749_vm11 = vcmp.ge.s32.totalorder %v323_v16, 1  ;;  %v147_v42 = vadd.s32 224, %v5117_v47  ;;  %vm6415_vm9 = vmmov %vm6379_vm8 }
  0x77   :  { %4521 = vmatmul.mubr.msk.bf16.gmra.mrb[28].mxu0 %vm6407_vm10, %v2447_v50  ;;  %4348 = vmatprep.mubr.msk.bf16.mxu1 %vm6379_vm8, %v735_v28  ;;  %v5721_v50 = vld [vmem:[#allocation2 + $0xaf] sm:$0xff]  ;;  %v715_v28 = vsel %vm5699_vm5, %v5703_v2, 0.0  ;;  %v2787_v61 = vpack.c.bf16 %v5548_v18, %v2756_v58  ;;  %vm6416_vm10 = vmmov %vm6379_vm8  ;;  %v337_v58 = vand.u32 15, %v145_v32  ;;  %v719_v16 = vsel %vm5749_vm11, %v5753_v43, 0.0 }
  0x78   :  { %4532 = vmatprep.mubr.msk.bf16.mxu0 %vm6408_vm0, %v2786_v25  ;;  %v2758_v25 = vsel %vm5381_vm13, %v5541_v44, 0.0  ;;  %v5736_v52 = vpack.c.bf16 %v5721_v50, %v1742_v8  ;;  %v737_v1 = vpack.c.bf16 %v5721_v50, %v715_v28  ;;  %vm5743_vm0 = vcmp.ge.s32.totalorder %v309_v53, 1  ;;  %v4934_v18 = vld [vmem:[%s6287_s1 + $0xe8] sm:$0xff]   ;;  %vm6414_vm13 = vmmov %vm6379_vm8 }
  0x79   :  { %v2788_v19 = vpack.c.bf16 %v5563_v13, %v2758_v25  ;;  %v5762_v13 = vld [vmem:[#allocation2 + $0xbf] sm:$0xff]  ;;  %v717_v53 = vsel %vm5743_vm0, %v5747_v12, 0.0  ;;  %v1744_v28 = vsel %vm5699_vm5, %v5747_v12, 0.0  ;;  %v2760_v8 = vsel %vm5452_vm6, %v5590_v40, 0.0  ;;  %v5775_v25 = vld [vmem:[#allocation2 + $0xcf] sm:$0xff] }
  0x7a   :  { %v351_v63 = vand.u32 15, %v147_v42  ;;  %v4936_v40 = vld [vmem:[%s6287_s1 + $0xf0] sm:$0xff]   ;;  %v738_v32 = vpack.c.bf16 %v5762_v13, %v717_v53  ;;  %vm5800_vm6 = vcmp.ge.s32.totalorder %v337_v58, 1  ;;  %v5810_v53 = vld [vmem:[#allocation2 + $0xe7] sm:$0xff] }
  0x7b   :  { %v5804_v42 = vld [vmem:[#allocation2 + $0xd7] sm:$0xff]  ;;  %v2780_v11 = vsel %vm5800_vm6, %v629_v30, 0.0 }
  0x7c   :  { %v1748_v58 = vsel %vm5749_vm11, %v5804_v42, 0.0  ;;  %v2776_v37 = vsel %vm5743_vm0, %v5804_v42, 0.0 }
  0x7e   :  { %4349 = vmatmul.mubr.msk.bf16.gmra.mrb[16].mxu1 %vm6414_vm13, %v736_v49  ;;  %v5781_v49 = vpack.c.bf16 %v5762_v13, %v1744_v28  ;;  %v739_v28 = vpack.c.bf16 %v5775_v25, %v719_v16  ;;  %vm6422_vm13 = vmmov %vm6379_vm8  ;;  %v628_v16 = vld [vmem:[#allocation2 + $0xef] sm:$0xff] }
  0x7f   :  { %4533 = vmatmul.mubr.msk.bf16.vlgmr.msra.gmra.mrb[0].mxu0 %vm6415_vm9, %v2787_v61  ;;  %4352 = vmatprep.mubr.msk.bf16.mxu1 %vm6416_vm10, %v737_v1  ;;  %v1746_v61 = vsel %vm5743_vm0, %v5753_v43, 0.0  ;;  %vm6423_vm9 = vmmov %vm6379_vm8 }
  0x80   :  { %4565 = vmatpush3.bf16.msra.mxu0 %v5368_v26  ;;  %4536 = vmatprep.mubr.msk.bf16.mxu0 %vm6379_vm8, %v2788_v19  ;;  %6417 = vst [vmem:[#allocation21_spill] sm:$0xff] %v5781_v49  ;;  %v2762_v26 = vsel %vm5537_vm7, %v5596_v21, 0.0  ;;  %v5793_v1 = vpack.c.bf16 %v5775_v25, %v1746_v61  ;;  %v2789_v19 = vpack.c.bf16 %v5605_v38, %v2760_v8  ;;  %v149_v49 = vadd.s32 240, %v5117_v47  ;;  %v4938_v47 = vld [vmem:[%s6287_s1 + $0xf8] sm:$0xff]   ;;  %vm6424_vm10 = vmmov %vm6379_vm8  ;;  %v3077_v61 = vld [vmem:[#allocation2 + $0x30] sm:$0xff] }
  0x81   :  { %4566 = vmatprep.subr.bf16.mxu0 %v4934_v18  ;;  %v2790_v34 = vpack.c.bf16 %v5617_v31, %v2762_v26  ;;  %vm5806_vm7 = vcmp.ge.s32.totalorder %v351_v63, 1  ;;  %v626_v38 = vld [vmem:[#allocation2 + $0xdf] sm:$0xff]  ;;  %v721_v31 = vsel %vm5800_vm6, %v5804_v42, 0.0  ;;  %v2764_v8 = vsel %vm5586_vm12, %v5648_v45, 0.0  ;;  %v3076_v42 = vld [vmem:[#allocation2 + $0x28] sm:$0xff] }
  0x82   :  { %v723_v26 = vsel %vm5806_vm7, %v5810_v53, 0.0  ;;  %v5831_v63 = vpack.c.bf16 %v626_v38, %v1748_v58  ;;  %v2797_v12 = vpack.c.bf16 %v626_v38, %v2776_v37  ;;  %v3100_v37 = vld [vmem:[#allocation2 + $0xe8] sm:$0xff] }
  0x84   :  { %4567 = vmatpush3.bf16.msra.mxu0 %v4934_v18  ;;  %v365_v18 = vand.u32 15, %v149_v49  ;;  %v1750_v49 = vsel %vm5800_vm6, %v5810_v53, 0.0 }
  0x85   :  { %4568 = vmatprep.subr.bf16.mxu0 %v4936_v40  ;;  %v5844_v45 = vpack.c.bf16 %v628_v16, %v1750_v49  ;;  %v2751_v49 = vld [vmem:[#allocation2 + $0x10f] sm:$0xff] }
  0x86   :  { %4353 = vmatmul.mubr.msk.bf16.gmra.mrb[20].mxu1 %vm6422_vm13, %v738_v32  ;;  %v2766_v32 = vsel %vm5592_vm14, %v5654_v0, 0.0  ;;  %vm5848_vm12 = vcmp.ge.s32.totalorder %v365_v18, 1  ;;  %v1275_v0 = vld [vmem:[#allocation2 + $0x11] sm:$0xff]  ;;  %vm6428_vm14 = vmmov %vm6379_vm8  ;;  %v1752_v18 = vsel %vm5806_vm7, %v629_v30, 0.0 }
  0x87   :  { %4537 = vmatmul.mubr.msk.bf16.gmra.mrb[4].mxu0 %vm6423_vm9, %v2789_v19  ;;  %4356 = vmatprep.mubr.msk.bf16.mxu1 %vm6424_vm10, %v739_v28  ;;  %6425 = vst [vmem:[#allocation22_spill] sm:$0xff] %v5844_v45  ;;  %v740_v19 = vpack.c.bf16 %v626_v38, %v721_v31  ;;  %v741_v28 = vpack.c.bf16 %v628_v16, %v723_v26  ;;  %vm6429_vm13 = vmmov %vm6379_vm8  ;;  %v630_v31 = vld [vmem:[#allocation2 + $0xff] sm:$0xff]  ;;  %v1371_v26 = vsel %vm5173_vm1, %v1275_v0, 0.0  ;;  %v4937_v0 = vld [vmem:[%s6287_s1 + $0x68] sm:$0xff]  }
  0x88   :  { %4540 = vmatprep.mubr.msk.bf16.mxu0 %vm6379_vm8, %v2790_v34  ;;  %4569 = vmatpush3.bf16.msra.mxu0 %v4936_v40  ;;  %v2791_v40 = vpack.c.bf16 %v5661_v35, %v2764_v8  ;;  %v2792_v34 = vpack.c.bf16 %v5672_v46, %v2766_v32  ;;  %vm6430_vm9 = vmmov %vm6379_vm8  ;;  %v725_v35 = vsel %vm5848_vm12, %v629_v30, 0.0  ;;  %v2750_v46 = vld [vmem:[#allocation2 + $0x107] sm:$0xff]  ;;  %v5866_v32 = vpack.c.bf16 %v630_v31, %v1752_v18  ;;  %v4943_v18 = vld [vmem:[%s6287_s1 + $0x110] sm:$0xff]  }
  0x89   :  { %4570 = vmatprep.subr.bf16.mxu0 %v4938_v47  ;;  %vm6431_vm10 = vmmov %vm6379_vm8  ;;  %v1274_v8 = vld [vmem:[#allocation2 + $0x9] sm:$0xff]  ;;  %v2782_v44 = vsel %vm5806_vm7, %v2750_v46, 0.0  ;;  %v3108_v38 = vpack.c.bf16 %v3077_v61, %v3076_v42 }
  0x8a   :  { %v3398_v42 = vld [vmem:[#allocation2 + $0x29] sm:$0xff] }
  0x8c   :  { %4571 = vmatpush3.bf16.msra.mxu0 %v4938_v47  ;;  %v2768_v47 = vsel %vm5644_vm4, %v5697_v33, 0.0  ;;  %v1402_v33 = vpack.c.bf16 %v1371_v26, %v1274_v8  ;;  %vm6432_vm4 = vmmov %vm6379_vm8  ;;  %v3087_v8 = vld [vmem:[#allocation2 + $0x80] sm:$0xff]  ;;  %v3088_v26 = vld [vmem:[#allocation2 + $0x88] sm:$0xff] }
  0x8d   :  { %4604 = vmatprep.subr.bf16.mxu0 %v5842_v9  ;;  %v2793_v39 = vpack.c.bf16 %v5709_v57, %v2768_v47  ;;  %vm6433_vm8 = vmmov %vm6432_vm4  ;;  %v2795_v57 = vpack.c.bf16 %v5762_v13, %v2772_v48  ;;  %v2800_v13 = vpack.c.bf16 %v2751_v49, %v2782_v44  ;;  %v3105_v44 = vld [vmem:[#allocation2 + $0x110] sm:$0xff] }
  0x8e   :  { %4357 = vmatmul.mubr.msk.bf16.gmra.mrb[24].mxu1 %vm6428_vm14, %v740_v19  ;;  %v1754_v19 = vsel %vm5848_vm12, %v2750_v46, 0.0  ;;  %vm6434_vm14 = vmmov %vm6432_vm4  ;;  %v3085_v46 = vld [vmem:[#allocation2 + $0x70] sm:$0xff] }
  0x8f   :  { %4541 = vmatmul.mubr.msk.bf16.gmra.mrb[8].mxu0 %vm6429_vm13, %v2791_v40  ;;  %4360 = vmatprep.mubr.msk.bf16.mxu1 %vm6430_vm9, %v741_v28  ;;  %v2770_v40 = vsel %vm5650_vm15, %v5703_v2, 0.0  ;;  %v5873_v28 = vpack.c.bf16 %v2751_v49, %v1754_v19  ;;  %vm6435_vm13 = vmmov %vm6432_vm4  ;;  %v2774_v2 = vsel %vm5699_vm5, %v5753_v43, 0.0  ;;  %v2799_v43 = vpack.c.bf16 %v630_v31, %v2780_v11  ;;  %v3089_v49 = vld [vmem:[#allocation2 + $0x90] sm:$0xff]  ;;  %v3104_v11 = vld [vmem:[#allocation2 + $0x108] sm:$0xff] }
  0x90   :  { %4544 = vmatprep.mubr.msk.bf16.mxu0 %vm6431_vm10, %v2792_v34  ;;  %v742_v34 = vpack.c.bf16 %v630_v31, %v725_v35  ;;  %v2794_v45 = vpack.c.bf16 %v5721_v50, %v2770_v40  ;;  %v2796_v50 = vpack.c.bf16 %v5775_v25, %v2774_v2  ;;  %vm6436_vm15 = vmmov %vm6432_vm4  ;;  %v2752_v25 = vld [vmem:[#allocation2 + $0x117] sm:$0xff]  ;;  %v4942_v31 = vld [vmem:[%s6287_s1 + $0x108] sm:$0xff]   ;;  %v3114_v40 = vpack.c.bf16 %v3089_v49, %v3088_v26 }
  0x91   :  { %vm6437_vm9 = vmmov %vm6432_vm4  ;;  %v2784_v21 = vsel %vm5848_vm12, %v2752_v25, 0.0  ;;  %v3084_v35 = vld [vmem:[#allocation2 + $0x68] sm:$0xff] }
  0x92   :  { %vm6438_vm3 = vmmov %vm6432_vm4  ;;  %v3096_v2 = vld [vmem:[#allocation2 + $0xc8] sm:$0xff] }
  0x93   :  { %vm6439_vm10 = vmmov %vm6438_vm3  ;;  %v6474_v25 = vld [vmem:[#allocation18_spill] sm:$0xff] }
  0x94   :  { %vm6440_vm5 = vmmov %vm6438_vm3 }
  0x95   :  { %vm6441_vm0 = vmmov %vm6438_vm3 }
  0x96   :  { %4361 = vmatmul.mubr.msk.bf16.gmra.mrb[28].mxu1 %vm6432_vm4, %v742_v34  ;;  %vm6442_vm4 = vmmov %vm6441_vm0  ;;  %v3092_v34 = vld [vmem:[#allocation2 + $0xa8] sm:$0xff] }
  0x97   :  { %4545 = vmatmul.mubr.msk.bf16.gmra.mrb[12].mxu0 %vm6433_vm8, %v2793_v39  ;;  %4372 = vmatprep.mubr.msk.bf16.mxu1 %vm6434_vm14, %v1402_v33  ;;  %vm6443_vm8 = vmmov %vm6441_vm0  ;;  %v3093_v39 = vld [vmem:[#allocation2 + $0xb0] sm:$0xff] }
  0x98   :  { %4548 = vmatprep.mubr.msk.bf16.mxu0 %vm6435_vm13, %v2794_v45  ;;  %vm6445_vm6 = vmmov %vm6441_vm0  ;;  %v3081_v45 = vld [vmem:[#allocation2 + $0x50] sm:$0xff]  ;;  %v5971_v48 = vpack.c.bf16 %v3093_v39, %v3092_v34 }
  0x99   :  { %vm6446_vm14 = vmmov %vm6441_vm0  ;;  %v3410_v39 = vld [vmem:[#allocation2 + $0x89] sm:$0xff] }
  0x9a   :  { %vm6447_vm7 = vmmov %vm6441_vm0 }
  0x9b   :  { %vm6448_vm13 = vmmov %vm6441_vm0 }
  0x9c   :  { %vm6452_vm12 = vmmov %vm6441_vm0 }
  0x9e   :  { %4373 = vmatmul.mubr.msk.bf16.vlgmr.msra.gmra.mrb[0].mxu1 %vm6436_vm15, %v5337_v36  ;;  %v2778_v36 = vsel %vm5749_vm11, %v5810_v53, 0.0  ;;  %vm6444_vm11 = vmmov %vm6441_vm0 }
  0x9f   :  { %4549 = vmatmul.mubr.msk.bf16.gmra.mrb[16].mxu0 %vm6437_vm9, %v2795_v57  ;;  %4405 = vmatpush3.bf16.msra.mxu1 %v5634_v27  ;;  %v2798_v27 = vpack.c.bf16 %v628_v16, %v2778_v36  ;;  %vm6449_vm15 = vmmov %vm6441_vm0  ;;  %v3080_v16 = vld [vmem:[#allocation2 + $0x48] sm:$0xff]  ;;  %v3097_v57 = vld [vmem:[#allocation2 + $0xd0] sm:$0xff] }
  0xa0   :  { %4376 = vmatprep.mubr.msk.bf16.mxu1 %vm6438_vm3, %v5378_v6  ;;  %4552 = vmatprep.mubr.msk.bf16.mxu0 %vm6439_vm10, %v2796_v50  ;;  %v4941_v6 = vld [vmem:[%s6287_s1 + $0x78] sm:$0xff]   ;;  %vm6450_vm9 = vmmov %vm6441_vm0  ;;  %v3110_v30 = vpack.c.bf16 %v3081_v45, %v3080_v16  ;;  %v4946_v36 = vld [vmem:[%s6287_s1 + $0x88] sm:$0xff]  }
  0xa1   :  { %4406 = vmatprep.subr.bf16.mxu1 %v4937_v0  ;;  %vm6451_vm3 = vmmov %vm6441_vm0  ;;  %v6482_v16 = vld [vmem:[#allocation20_spill] sm:$0xff] }
  0xa2   :  { %vm6453_vm10 = vmmov %vm6441_vm0  ;;  %v3400_v45 = vld [vmem:[#allocation2 + $0x39] sm:$0xff] }
  0xa3   :  { %4407 = vmatpush3.bf16.msra.mxu1 %v4937_v0  ;;  %v5983_v0 = vpack.c.bf16 %v3097_v57, %v3096_v2 }
  0xa4   :  { %4408 = vmatprep.subr.bf16.mxu1 %v4939_v20 }
  0xa6   :  { %4377 = vmatmul.mubr.msk.bf16.gmra.mrb[4].mxu1 %vm6440_vm5, %v5398_v22  ;;  %v5924_v22 = vld [vmem:[%s6287_s1 + $0x80] sm:$0xff]   ;;  %vm6454_vm5 = vmmov %vm6441_vm0 }
  0xa7   :  { %4553 = vmatmul.mubr.msk.bf16.gmra.mrb[20].mxu0 %vm6441_vm0, %v2797_v12  ;;  %4380 = vmatprep.mubr.msk.bf16.mxu1 %vm6442_vm4, %v5419_v41  ;;  %v2753_v41 = vld [vmem:[#allocation2 + $0x11f] sm:$0xff]  ;;  %vm6455_vm4 = vmmov %vm6441_vm0 }
  0xa8   :  { %4556 = vmatprep.mubr.msk.bf16.mxu0 %vm6443_vm8, %v2798_v27  ;;  %4409 = vmatpush3.bf16.msra.mxu1 %v4939_v20  ;;  %v2801_v53 = vpack.c.bf16 %v2753_v41, %v2784_v21  ;;  %vm6456_vm8 = vmmov %vm6441_vm0  ;;  %v3101_v20 = vld [vmem:[#allocation2 + $0xf0] sm:$0xff]  ;;  %v3102_v27 = vld [vmem:[#allocation2 + $0xf8] sm:$0xff] }
  0xa9   :  { %4410 = vmatprep.subr.bf16.mxu1 %v4941_v6  ;;  %v5999_v12 = vpack.c.bf16 %v3101_v20, %v3100_v37  ;;  %v3106_v41 = vld [vmem:[#allocation2 + $0x118] sm:$0xff]  ;;  %v3107_v21 = vld [vmem:[#allocation2 + $0x120] sm:$0xff] }
  0xaa   :  { %v6508_v37 = vld [vmem:[#allocation9_spill] sm:$0xff] }
  0xac   :  { %4411 = vmatpush3.bf16.msra.mxu1 %v4941_v6  ;;  %v3103_v6 = vld [vmem:[#allocation2 + $0x100] sm:$0xff] }
  0xad   :  { %4644 = vmatprep.subr.bf16.mxu1 %v5924_v22 }
  0xae   :  { %4381 = vmatmul.mubr.msk.bf16.gmra.mrb[8].mxu1 %vm6444_vm11, %v5440_v59  ;;  %v3078_v59 = vld [vmem:[#allocation2 + $0x38] sm:$0xff]  ;;  %vm6457_vm11 = vmmov %vm6441_vm0 }
  0xaf   :  { %4557 = vmatmul.mubr.msk.bf16.gmra.mrb[24].mxu0 %vm6445_vm6, %v2799_v43  ;;  %4384 = vmatprep.mubr.msk.bf16.mxu1 %vm6446_vm14, %v5457_v62  ;;  %v3079_v62 = vld [vmem:[#allocation2 + $0x40] sm:$0xff]  ;;  %vm6458_vm6 = vmmov %vm6441_vm0  ;;  %v4948_v43 = vld [vmem:[%s6287_s1 + $0x98] sm:$0xff]  }
  0xb0   :  { %4560 = vmatprep.mubr.msk.bf16.mxu0 %vm6447_vm7, %v2800_v13  ;;  %v3109_v58 = vpack.c.bf16 %v3079_v62, %v3078_v59  ;;  %vm6459_vm14 = vmmov %vm6441_vm0  ;;  %v6017_v13 = vpack.c.bf16 %v3105_v44, %v3104_v11  ;;  %v3401_v59 = vld [vmem:[#allocation2 + $0x41] sm:$0xff]  ;;  %v3403_v62 = vld [vmem:[#allocation2 + $0x51] sm:$0xff] }
  0xb1   :  { %vm6460_vm7 = vmmov %vm6441_vm0  ;;  %v3417_v44 = vld [vmem:[#allocation2 + $0xc1] sm:$0xff] }
  0xb6   :  { %4385 = vmatmul.mubr.msk.bf16.gmra.mrb[12].mxu1 %vm6448_vm13, %v5460_v14  ;;  %v3082_v14 = vld [vmem:[#allocation2 + $0x58] sm:$0xff]  ;;  %vm6461_vm13 = vmmov %vm6441_vm0 }
  0xb7   :  { %4561 = vmatmul.mubr.msk.bf16.gmra.mrb[28].mxu0 %vm6449_vm15, %v2801_v53  ;;  %4388 = vmatprep.mubr.msk.bf16.mxu1 %vm6450_vm9, %v5466_v29  ;;  %v3083_v29 = vld [vmem:[#allocation2 + $0x60] sm:$0xff]  ;;  %vm6462_vm15 = vmmov %vm6441_vm0  ;;  %v3123_v53 = vpack.c.bf16 %v3107_v21, %v3106_v41  ;;  %v6518_v41 = vld [vmem:[#allocation12_spill] sm:$0xff] }
  0xb8   :  { %4572 = vmatprep.mubr.msk.bf16.mxu0 %vm6451_vm3, %v3108_v38  ;;  %v3111_v47 = vpack.c.bf16 %v3083_v29, %v3082_v14  ;;  %vm6463_vm9 = vmmov %vm6441_vm0 }
  0xb9   :  { %vm6464_vm3 = vmmov %vm6441_vm0 }
  0xbe   :  { %4389 = vmatmul.mubr.msk.bf16.gmra.mrb[16].mxu1 %vm6452_vm12, %v5476_v4  ;;  %v3112_v4 = vpack.c.bf16 %v3085_v46, %v3084_v35  ;;  %vm6465_vm12 = vmmov %vm6441_vm0  ;;  %v3405_v46 = vld [vmem:[#allocation2 + $0x61] sm:$0xff] }
  0xbf   :  { %4573 = vmatmul.mubr.msk.bf16.vlgmr.msra.gmra.mrb[0].mxu0 %vm6453_vm10, %v3109_v58  ;;  %4392 = vmatprep.mubr.msk.bf16.mxu1 %vm6454_vm5, %v5484_v15  ;;  %v4944_v15 = vld [vmem:[%s6287_s1 + $0x118] sm:$0xff]   ;;  %vm6466_vm10 = vmmov %vm6441_vm0 }
  0xc0   :  { %4605 = vmatpush3.bf16.msra.mxu0 %v5842_v9  ;;  %4576 = vmatprep.mubr.msk.bf16.mxu0 %vm6441_vm0, %v3110_v30  ;;  %v3086_v9 = vld [vmem:[#allocation2 + $0x78] sm:$0xff]  ;;  %vm6467_vm5 = vmmov %vm6441_vm0  ;;  %v3433_v30 = vsel %vm5214_vm2, %v3401_v59, 0.0 }
  0xc1   :  { %4606 = vmatprep.subr.bf16.mxu0 %v4942_v31  ;;  %v3113_v19 = vpack.c.bf16 %v3087_v8, %v3086_v9  ;;  %v3463_v29 = vpack.c.bf16 %v3433_v30, %v3400_v45  ;;  %v3406_v9 = vld [vmem:[#allocation2 + $0x69] sm:$0xff] }
  0xc2   :  { %v6494_v8 = vld [vmem:[#allocation6_spill] sm:$0xff] }
  0xc4   :  { %4607 = vmatpush3.bf16.msra.mxu0 %v4942_v31  ;;  %v6485_v31 = vld [vmem:[#allocation4_spill] sm:$0xff] }
  0xc5   :  { %4608 = vmatprep.subr.bf16.mxu0 %v4943_v18 }
  0xc6   :  { %4393 = vmatmul.mubr.msk.bf16.gmra.mrb[20].mxu1 %vm6455_vm4, %v5491_v51  ;;  %v3090_v51 = vld [vmem:[#allocation2 + $0x98] sm:$0xff]  ;;  %vm6468_vm4 = vmmov %vm6441_vm0 }
  0xc7   :  { %4577 = vmatmul.mubr.msk.bf16.gmra.mrb[4].mxu0 %vm6456_vm8, %v3111_v47  ;;  %4396 = vmatprep.mubr.msk.bf16.mxu1 %vm6457_vm11, %v5507_v3  ;;  %v3091_v3 = vld [vmem:[#allocation2 + $0xa0] sm:$0xff]  ;;  %vm6469_vm8 = vmmov %vm6441_vm0 }
  0xc8   :  { %4580 = vmatprep.mubr.msk.bf16.mxu0 %vm6458_vm6, %v3112_v4  ;;  %4609 = vmatpush3.bf16.msra.mxu0 %v4943_v18  ;;  %v5969_v33 = vpack.c.bf16 %v3091_v3, %v3090_v51  ;;  %vm6470_vm11 = vmmov %vm6441_vm0  ;;  %v6489_v18 = vld [vmem:[#allocation21_spill] sm:$0xff]  ;;  %v6500_v3 = vld [vmem:[#allocation7_spill] sm:$0xff] }
  0xc9   :  { %4610 = vmatprep.subr.bf16.mxu0 %v4944_v15  ;;  %vm6471_vm6 = vmmov %vm6441_vm0  ;;  %v3404_v47 = vld [vmem:[#allocation2 + $0x59] sm:$0xff] }
  0xca   :  { %v6492_v4 = vld [vmem:[#allocation5_spill] sm:$0xff] }
  0xcb   :  { %vm6493_vm2 = vnez %v6492_v4  ;;  %v3408_v51 = vld [vmem:[#allocation2 + $0x79] sm:$0xff] }
  0xcc   :  { %4611 = vmatpush3.bf16.msra.mxu0 %v4944_v15  ;;  %v3437_v15 = vsel %vm6493_vm2, %v3405_v46, 0.0  ;;  %vm6514_vm2 = vmmov %vm6441_vm0 }
  0xcd   :  { %v3465_v49 = vpack.c.bf16 %v3437_v15, %v3404_v47  ;;  %v3429_v47 = vld [vmem:[#allocation2 + $0x121] sm:$0xff] }
  0xce   :  { %4397 = vmatmul.mubr.msk.bf16.gmra.mrb[24].mxu1 %vm6459_vm14, %v5509_v56  ;;  %v3094_v56 = vld [vmem:[#allocation2 + $0xb8] sm:$0xff]  ;;  %vm6472_vm14 = vmmov %vm6441_vm0 }
  0xcf   :  { %4581 = vmatmul.mubr.msk.bf16.gmra.mrb[8].mxu0 %vm6460_vm7, %v3113_v19  ;;  %4400 = vmatprep.mubr.msk.bf16.mxu1 %vm6461_vm13, %v5512_v23  ;;  %v3095_v23 = vld [vmem:[#allocation2 + $0xc0] sm:$0xff]  ;;  %vm6473_vm7 = vmmov %vm6441_vm0 }
  0xd0   :  { %4584 = vmatprep.mubr.msk.bf16.mxu0 %vm6462_vm15, %v3114_v40  ;;  %v5981_v50 = vpack.c.bf16 %v3095_v23, %v3094_v56  ;;  %vm6475_vm13 = vmmov %vm6441_vm0  ;;  %v3409_v40 = vld [vmem:[#allocation2 + $0x81] sm:$0xff]  ;;  %v6502_v56 = vld [vmem:[#allocation8_spill] sm:$0xff] }
  0xd1   :  { %vm6476_vm15 = vmmov %vm6441_vm0 }
  0xd6   :  { %4401 = vmatmul.mubr.msk.bf16.gmra.mrb[28].mxu1 %vm6463_vm9, %v5520_v17  ;;  %v3099_v17 = vld [vmem:[#allocation2 + $0xe0] sm:$0xff]  ;;  %vm6478_vm9 = vmmov %vm6441_vm0 }
  0xd7   :  { %4585 = vmatmul.mubr.msk.bf16.gmra.mrb[12].mxu0 %vm6464_vm3, %v5969_v33  ;;  %4412 = vmatprep.mubr.msk.bf16.mxu1 %vm6465_vm12, %v5530_v60  ;;  %v3098_v60 = vld [vmem:[#allocation2 + $0xd8] sm:$0xff]  ;;  %vm6479_vm3 = vmmov %vm6441_vm0 }
  0xd8   :  { %4588 = vmatprep.mubr.msk.bf16.mxu0 %vm6466_vm10, %v5971_v48  ;;  %vm6480_vm12 = vmmov %vm6441_vm0 }
  0xd9   :  { %vm6481_vm10 = vmmov %vm6441_vm0 }
  0xde   :  { %4413 = vmatmul.mubr.msk.bf16.vlgmr.msra.gmra.mrb[0].mxu1 %vm6467_vm5, %v5533_v24  ;;  %v5997_v24 = vpack.c.bf16 %v3099_v17, %v3098_v60  ;;  %vm6483_vm5 = vmmov %vm6441_vm0  ;;  %v3413_v60 = vld [vmem:[#allocation2 + $0xa1] sm:$0xff]  ;;  %v3415_v17 = vld [vmem:[#allocation2 + $0xb1] sm:$0xff] }
  0xdf   :  { %4589 = vmatmul.mubr.msk.bf16.gmra.mrb[16].mxu0 %vm6441_vm0, %v5981_v50  ;;  %4648 = vmatpush3.bf16.msra.mxu1 %v5924_v22  ;;  %v6477_v22 = vld [vmem:[#allocation19_spill] sm:$0xff] }
  0xe0   :  { %4416 = vmatprep.mubr.msk.bf16.mxu1 %vm6468_vm4, %v5572_v10  ;;  %4592 = vmatprep.mubr.msk.bf16.mxu0 %vm6469_vm8, %v5983_v0  ;;  %v4947_v10 = vld [vmem:[%s6287_s1 + $0x90] sm:$0xff]   ;;  %vm6487_vm4 = vmmov %vm6441_vm0 }
  0xe1   :  { %4645 = vmatprep.subr.bf16.mxu1 %v4946_v36  ;;  %vm6488_vm8 = vmmov %vm6441_vm0 }
  0xe3   :  { %4649 = vmatpush3.bf16.msra.mxu1 %v4946_v36  ;;  %v3414_v36 = vld [vmem:[#allocation2 + $0xa9] sm:$0xff] }
  0xe4   :  { %4646 = vmatprep.subr.bf16.mxu1 %v4947_v10 }
  0xe6   :  { %4417 = vmatmul.mubr.msk.bf16.gmra.mrb[4].mxu1 %vm6470_vm11, %v5581_v5  ;;  %v6015_v5 = vpack.c.bf16 %v3103_v6, %v3102_v27  ;;  %vm6490_vm11 = vmmov %vm6441_vm0 }
  0xe7   :  { %4593 = vmatmul.mubr.msk.bf16.gmra.mrb[20].mxu0 %vm6471_vm6, %v5997_v24  ;;  %4420 = vmatprep.mubr.msk.bf16.mxu1 %vm6472_vm14, %v5623_v54  ;;  %v3399_v54 = vld [vmem:[#allocation2 + $0x31] sm:$0xff]  ;;  %vm6491_vm6 = vmmov %vm6441_vm0  ;;  %vm6495_vm14 = vnez %v6494_v8 }
  0xe8   :  { %4596 = vmatprep.mubr.msk.bf16.mxu0 %vm6473_vm7, %v5999_v12  ;;  %4650 = vmatpush3.bf16.msra.mxu1 %v4947_v10  ;;  %v3431_v61 = vsel %vm5173_vm1, %v3399_v54, 0.0  ;;  %vm6486_vm1 = vnez %v6485_v31  ;;  %vm6496_vm7 = vmmov %vm6441_vm0  ;;  %v6510_v10 = vld [vmem:[#allocation10_spill] sm:$0xff]  ;;  %v6531_v31 = vld [vmem:[#allocation15_spill] sm:$0xff] }
  0xe9   :  { %4647 = vmatprep.subr.bf16.mxu1 %v4948_v43  ;;  %v3462_v38 = vpack.c.bf16 %v3431_v61, %v3398_v42  ;;  %v3435_v14 = vsel %vm6486_vm1, %v3403_v62, 0.0  ;;  %vm6507_vm1 = vmmov %vm6441_vm0  ;;  %v3422_v62 = vld [vmem:[#allocation2 + $0xe9] sm:$0xff] }
  0xea   :  { %v3464_v35 = vpack.c.bf16 %v3435_v14, %v3402_v7  ;;  %v3425_v7 = vld [vmem:[#allocation2 + $0x101] sm:$0xff] }
  0xec   :  { %4651 = vmatpush3.bf16.msra.mxu1 %v4948_v43  ;;  %v3419_v43 = vld [vmem:[#allocation2 + $0xd1] sm:$0xff] }
  0xee   :  { %4421 = vmatmul.mubr.msk.bf16.gmra.mrb[8].mxu1 %vm6475_vm13, %v6474_v25  ;;  %vm6497_vm13 = vmmov %vm6441_vm0  ;;  %v6516_v25 = vld [vmem:[#allocation11_spill] sm:$0xff] }
  0xef   :  { %4597 = vmatmul.mubr.msk.bf16.gmra.mrb[24].mxu0 %vm6476_vm15, %v6015_v5  ;;  %4424 = vmatprep.mubr.msk.bf16.mxu1 %vm6478_vm9, %v6477_v22  ;;  %vm6498_vm15 = vmmov %vm6441_vm0  ;;  %v3418_v22 = vld [vmem:[#allocation2 + $0xc9] sm:$0xff] }
  0xf0   :  { %4600 = vmatprep.mubr.msk.bf16.mxu0 %vm6479_vm3, %v6017_v13  ;;  %vm6499_vm9 = vmmov %vm6441_vm0  ;;  %vm6501_vm3 = vnez %v6500_v3 }
  0xf1   :  { %v3441_v34 = vsel %vm6501_vm3, %v3409_v40, 0.0  ;;  %vm6522_vm3 = vmmov %vm6441_vm0 }
  0xf2   :  { %v3467_v2 = vpack.c.bf16 %v3441_v34, %v3408_v51 }
  0xf6   :  { %4425 = vmatmul.mubr.msk.bf16.gmra.mrb[12].mxu1 %vm6480_vm12, %v5687_v55  ;;  %v3407_v55 = vld [vmem:[#allocation2 + $0x71] sm:$0xff]  ;;  %vm6503_vm12 = vnez %v6502_v56 }
  0xf7   :  { %4601 = vmatmul.mubr.msk.bf16.gmra.mrb[28].mxu0 %vm6481_vm10, %v3123_v53  ;;  %4428 = vmatprep.mubr.msk.bf16.mxu1 %vm6483_vm5, %v6482_v16  ;;  %v3439_v26 = vsel %vm6495_vm14, %v3407_v55, 0.0  ;;  %vm6505_vm10 = vmmov %vm6441_vm0  ;;  %v3421_v53 = vld [vmem:[#allocation2 + $0xe1] sm:$0xff] }
  0xf8   :  { %4612 = vmatprep.mubr.msk.bf16.mxu0 %vm6441_vm0, %v3462_v38  ;;  %v3466_v19 = vpack.c.bf16 %v3439_v26, %v3406_v9  ;;  %vm6506_vm5 = vmmov %vm6441_vm0  ;;  %v6524_v38 = vld [vmem:[#allocation13_spill] sm:$0xff]  ;;  %v6526_v16 = vld [vmem:[#allocation14_spill] sm:$0xff] }
  0xf9   :  { %vm6515_vm14 = vmmov %vm6441_vm0 }
  0xfe   :  { %4429 = vmatmul.mubr.msk.bf16.gmra.mrb[16].mxu1 %vm6487_vm4, %v5736_v52  ;;  %v3411_v52 = vld [vmem:[#allocation2 + $0x91] sm:$0xff]  ;;  %vm6509_vm4 = vnez %v6508_v37 }
  0xff   :  { %4613 = vmatmul.mubr.msk.bf16.vlgmr.msra.gmra.mrb[0].mxu0 %vm6488_vm8, %v3463_v29  ;;  %4432 = vmatprep.mubr.msk.bf16.mxu1 %vm6490_vm11, %v6489_v18  ;;  %v3443_v23 = vsel %vm6503_vm12, %v3411_v52, 0.0  ;;  %v3445_v20 = vsel %vm6509_vm4, %v3413_v60, 0.0  ;;  %vm6511_vm8 = vnez %v6510_v10  ;;  %vm6512_vm11 = vmmov %vm6441_vm0  ;;  %v3426_v29 = vld [vmem:[#allocation2 + $0x109] sm:$0xff] }
 0x100   :  { %4616 = vmatprep.mubr.msk.bf16.mxu0 %vm6491_vm6, %v3464_v35  ;;  %v3468_v57 = vpack.c.bf16 %v3443_v23, %v3410_v39  ;;  %v3447_v27 = vsel %vm6511_vm8, %v3415_v17, 0.0  ;;  %vm6513_vm6 = vmmov %vm6441_vm0  ;;  %v6533_v35 = vld [vmem:[#allocation16_spill] sm:$0xff] }
 0x101   :  { %v3470_v11 = vpack.c.bf16 %v3447_v27, %v3414_v36  ;;  %vm6523_vm12 = vmmov %vm6441_vm0 }
 0x102   :  { %vm6529_vm4 = vmmov %vm6441_vm0 }
 0x103   :  { %vm6530_vm8 = vmmov %vm6441_vm0 }
 0x106   :  { %4433 = vmatmul.mubr.msk.bf16.gmra.mrb[20].mxu1 %vm6496_vm7, %v5793_v1  ;;  %v6504_v1 = vld [vmem:[#allocation22_spill] sm:$0xff]  ;;  %vm6517_vm7 = vnez %v6516_v25 }
 0x107   :  { %4617 = vmatmul.mubr.msk.bf16.gmra.mrb[4].mxu0 %vm6497_vm13, %v3465_v49  ;;  %4436 = vmatprep.mubr.msk.bf16.mxu1 %vm6498_vm15, %v5831_v63  ;;  %v3412_v63 = vld [vmem:[#allocation2 + $0x99] sm:$0xff]  ;;  %v3449_v54 = vsel %vm6517_vm7, %v3417_v44, 0.0  ;;  %vm6519_vm13 = vnez %v6518_v41  ;;  %vm6520_vm15 = vmmov %vm6441_vm0 }
 0x108   :  { %4620 = vmatprep.mubr.msk.bf16.mxu0 %vm6499_vm9, %v3466_v19  ;;  %v3469_v6 = vpack.c.bf16 %v3445_v20, %v3412_v63  ;;  %v3451_v21 = vsel %vm6519_vm13, %v3419_v43, 0.0  ;;  %vm6521_vm9 = vmmov %vm6441_vm0 }
 0x109   :  { %v3472_v61 = vpack.c.bf16 %v3451_v21, %v3418_v22  ;;  %vm6537_vm7 = vmmov %vm6441_vm0 }
 0x10a   :  { %vm6538_vm13 = vmmov %vm6441_vm0 }
 0x10e   :  { %4437 = vmatmul.mubr.msk.bf16.gmra.mrb[24].mxu1 %vm6505_vm10, %v6504_v1  ;;  %vm6525_vm10 = vnez %v6524_v38 }
 0x10f   :  { %4621 = vmatmul.mubr.msk.bf16.gmra.mrb[8].mxu0 %vm6506_vm5, %v3467_v2  ;;  %4440 = vmatprep.mubr.msk.bf16.mxu1 %vm6441_vm0, %v5866_v32  ;;  %v3416_v32 = vld [vmem:[#allocation2 + $0xb9] sm:$0xff]  ;;  %v3453_v59 = vsel %vm6525_vm10, %v3421_v53, 0.0  ;;  %vm6527_vm5 = vnez %v6526_v16  ;;  %vm6544_vm10 = vmmov %vm6441_vm0 }
 0x110   :  { %4624 = vmatprep.mubr.msk.bf16.mxu0 %vm6507_vm1, %v3468_v57  ;;  %v3471_v42 = vpack.c.bf16 %v3449_v54, %v3416_v32  ;;  %vm6528_vm1 = vmmov %vm6441_vm0  ;;  %v6121_v57 = vld [vmem:[%s6289_s2] ss:$0 sm:$0xff] }
 0x116   :  { %4441 = vmatmul.mubr.msk.bf16.gmra.mrb[28].mxu1 %vm6512_vm11, %v5873_v28  ;;  %v3423_v28 = vld [vmem:[#allocation2 + $0xf1] sm:$0xff]  ;;  %vm6532_vm11 = vnez %v6531_v31 }
 0x117   :  { %4625 = vmatmul.mubr.msk.bf16.gmra.mrb[12].mxu0 %vm6513_vm6, %v3469_v6  ;;  %4468 = vmatprep.mubr.msk.bf16.mxu1 %vm6514_vm2, %v5969_v33  ;;  %v3420_v33 = vld [vmem:[#allocation2 + $0xd9] sm:$0xff]  ;;  %v3455_v45 = vsel %vm6527_vm5, %v3423_v28, 0.0  ;;  %v3457_v14 = vsel %vm6532_vm11, %v3425_v7, 0.0  ;;  %vm6534_vm6 = vnez %v6533_v35  ;;  %vm6535_vm2 = vmmov %vm6441_vm0 }
 0x118   :  { %4628 = vmatprep.mubr.msk.bf16.mxu0 %vm6515_vm14, %v3470_v11  ;;  %v3473_v58 = vpack.c.bf16 %v3453_v59, %v3420_v33  ;;  %v3474_v30 = vpack.c.bf16 %v3455_v45, %v3422_v62  ;;  %vm6536_vm14 = vmmov %vm6441_vm0 }
 0x119   :  { %vm6545_vm5 = vmmov %vm6441_vm0 }
 0x11a   :  { %vm6549_vm11 = vmmov %vm6441_vm0 }
 0x11e   :  { %4469 = vmatmul.mubr.msk.bf16.vlgmr.msra.gmra.mrb[16].mxu1 %vm6520_vm15, %v5971_v48  ;;  %v3427_v48 = vld [vmem:[#allocation2 + $0x111] sm:$0xff] }
 0x11f   :  { %4629 = vmatmul.mubr.msk.bf16.gmra.mrb[16].mxu0 %vm6521_vm9, %v3471_v42  ;;  %4472 = vmatprep.mubr.msk.bf16.mxu1 %vm6522_vm3, %v5981_v50  ;;  %v3424_v50 = vld [vmem:[#allocation2 + $0xf9] sm:$0xff]  ;;  %v3459_v46 = vsel %vm6534_vm6, %v3427_v48, 0.0  ;;  %vm6541_vm9 = vmmov %vm6441_vm0 }
 0x120   :  { %4632 = vmatprep.mubr.msk.bf16.mxu0 %vm6523_vm12, %v3472_v61  ;;  %v3475_v55 = vpack.c.bf16 %v3457_v14, %v3424_v50  ;;  %v3476_v18 = vpack.c.bf16 %v3459_v46, %v3426_v29  ;;  %vm6542_vm3 = vmmov %vm6441_vm0 }
 0x121   :  { %vm6543_vm12 = vmmov %vm6441_vm0 }
 0x122   :  { %vm6550_vm6 = vmmov %vm6441_vm0 }
 0x126   :  { %4473 = vmatmul.mubr.msk.bf16.gmra.mrb[20].mxu1 %vm6441_vm0, %v5983_v0  ;;  %v3428_v0 = vld [vmem:[#allocation2 + $0x119] sm:$0xff] }
 0x127   :  { %4633 = vmatmul.mubr.msk.bf16.gmra.mrb[20].mxu0 %vm6528_vm1, %v3473_v58  ;;  %4476 = vmatprep.mubr.msk.bf16.mxu1 %vm6529_vm4, %v5997_v24  ;;  %v6539_v24 = vld [vmem:[#allocation17_spill] sm:$0xff]  ;;  %vm6546_vm1 = vmmov %vm6441_vm0 }
 0x128   :  { %4636 = vmatprep.mubr.msk.bf16.mxu0 %vm6530_vm8, %v3474_v30  ;;  %vm6540_vm15 = vnez %v6539_v24  ;;  %vm6547_vm4 = vmmov %vm6441_vm0 }
 0x129   :  { %v3461_v4 = vsel %vm6540_vm15, %v3429_v47, 0.0  ;;  %vm6548_vm8 = vmmov %vm6441_vm0 }
 0x12a   :  { %v3477_v15 = vpack.c.bf16 %v3461_v4, %v3428_v0  ;;  %vm6555_vm15 = vmmov %vm6441_vm0 }
 0x12e   :  { %4477 = vmatmul.mubr.msk.bf16.gmra.mrb[24].mxu1 %vm6535_vm2, %v5999_v12  ;;  %vm6551_vm2 = vmmov %vm6441_vm0 }
 0x12f   :  { %4637 = vmatmul.mubr.msk.bf16.gmra.mrb[24].mxu0 %vm6536_vm14, %v3475_v55  ;;  %4480 = vmatprep.mubr.msk.bf16.mxu1 %vm6537_vm7, %v6015_v5  ;;  %vm6552_vm14 = vmmov %vm6441_vm0 }
 0x130   :  { %4640 = vmatprep.mubr.msk.bf16.mxu0 %vm6538_vm13, %v3476_v18  ;;  %vm6553_vm7 = vmmov %vm6441_vm0 }
 0x131   :  { %vm6554_vm13 = vmmov %vm6441_vm0 }
 0x136   :  { %4481 = vmatmul.mubr.msk.bf16.gmra.mrb[28].mxu1 %vm6541_vm9, %v6017_v13  ;;  %vm6556_vm9 = vmmov %vm6441_vm0 }
 0x137   :  { %4641 = vmatmul.mubr.msk.bf16.gmra.mrb[28].mxu0 %vm6542_vm3, %v3477_v15  ;;  %vm6557_vm3 = vmmov %vm6441_vm0 }
 0x1b1   :  { %v4414_v9 = vpop.f32.mrb[0].mxu1 }
 0x1b2   :  { %v1887_v8 = vpop.f32.mrb[1].mxu1 }
 0x1b3   :  { %v4415_v12 = vpop.f32.mrb[2].mxu1 }
 0x1b4   :  { %v1890_v26 = vpop.f32.mrb[3].mxu1 }
 0x1b9   :  { %v4418_v49 = vpop.f32.mrb[4].mxu1 }
 0x1ba   :  { %v1903_v19 = vpop.f32.mrb[5].mxu1 }
 0x1bb   :  { %v4419_v40 = vpop.f32.mrb[6].mxu1 }
 0x1bc   :  { %v1906_v5 = vpop.f32.mrb[7].mxu1 }
 0x1c1   :  { %v4422_v52 = vpop.f32.mrb[8].mxu1 }
 0x1c2   :  { %v1919_v51 = vpop.f32.mrb[9].mxu1 }
 0x1c3   :  { %v4423_v3 = vpop.f32.mrb[10].mxu1 }
 0x1c4   :  { %v1922_v34 = vpop.f32.mrb[11].mxu1 }
 0x1c9   :  { %v6110_v39 = vpop.f32.mrb[12].mxu1 }
 0x1ca   :  { %v6112_v56 = vpop.f32.mrb[13].mxu1 }
 0x1cb   :  { %v6114_v23 = vpop.f32.mrb[14].mxu1 }
 0x1cc   :  { %v6116_v13 = vpop.f32.mrb[15].mxu1 }
 0x1d2   :  { %v4614_v2 = vpop.f32.mrb[0].mxu0 }
 0x1d3   :  { %v4652_v60 = vadd.f32 %v4614_v2, %v4414_v9  ;;  %v3593_v1 = vpop.f32.mrb[1].mxu0 }
 0x1d4   :  { %v4653_v17 = vadd.f32 %v3593_v1, %v1887_v8  ;;  %v4615_v63 = vpop.f32.mrb[2].mxu0 }
 0x1d5   :  { %v3761_v37 = vadd.f32 %v4652_v60, %v6121_v57  ;;  %v4654_v20 = vadd.f32 %v4615_v63, %v4415_v12  ;;  %v3596_v36 = vpop.f32.mrb[3].mxu0 }
 0x1d6   :  { %v3759_v10 = vadd.f32 %v4653_v17, %v6121_v57  ;;  %v4655_v27 = vadd.f32 %v3596_v36, %v1890_v26 }
 0x1d7   :  { %v3793_v6 = vmax.f32 %v3761_v37, 0.0  ;;  %v3762_v11 = vadd.f32 %v4654_v20, %v6121_v57 }
 0x1d8   :  { %v3791_v44 = vmax.f32 %v3759_v10, 0.0  ;;  %v3760_v43 = vadd.f32 %v4655_v27, %v6121_v57 }
 0x1d9   :  { %3825 = vst.msk [vmem:[%s6290_s3 + $0x10] sm:$0xff] %vm6543_vm12, %v3793_v6  ;;  %v3794_v32 = vmax.f32 %v3762_v11, 0.0  ;;  %vm6558_vm12 = vmmov %vm6441_vm0 }
 0x1da   :  { %3823 = vst.msk [vmem:[%s6290_s3] sm:$0xff] %vm6544_vm10, %v3791_v44  ;;  %v3792_v25 = vmax.f32 %v3760_v43, 0.0  ;;  %v4618_v54 = vpop.f32.mrb[4].mxu0  ;;  %vm6559_vm10 = vmmov %vm6441_vm0 }
 0x1db   :  { %3826 = vst.msk [vmem:[%s6290_s3 + $0x18] sm:$0xff] %vm6545_vm5, %v3794_v32  ;;  %v4656_v22 = vadd.f32 %v4618_v54, %v4418_v49  ;;  %v3609_v41 = vpop.f32.mrb[5].mxu0  ;;  %vm6560_vm5 = vmmov %vm6441_vm0 }
 0x1dc   :  { %3824 = vst.msk [vmem:[%s6290_s3 + $0x8] sm:$0xff] %vm6441_vm0, %v3792_v25  ;;  %v4657_v21 = vadd.f32 %v3609_v41, %v1903_v19  ;;  %v4619_v42 = vpop.f32.mrb[6].mxu0 }
 0x1dd   :  { %v3765_v61 = vadd.f32 %v4656_v22, %v6121_v57  ;;  %v4658_v53 = vadd.f32 %v4619_v42, %v4419_v40  ;;  %v3612_v28 = vpop.f32.mrb[7].mxu0 }
 0x1de   :  { %v3763_v33 = vadd.f32 %v4657_v21, %v6121_v57  ;;  %v4659_v38 = vadd.f32 %v3612_v28, %v1906_v5 }
 0x1df   :  { %v3797_v59 = vmax.f32 %v3765_v61, 0.0  ;;  %v3766_v62 = vadd.f32 %v4658_v53, %v6121_v57 }
 0x1e0   :  { %v3795_v16 = vmax.f32 %v3763_v33, 0.0  ;;  %v3764_v45 = vadd.f32 %v4659_v38, %v6121_v57 }
 0x1e1   :  { %3829 = vst.msk [vmem:[%s6290_s3 + $0x30] sm:$0xff] %vm6546_vm1, %v3797_v59  ;;  %v3798_v58 = vmax.f32 %v3766_v62, 0.0  ;;  %vm6561_vm1 = vmmov %vm6441_vm0 }
 0x1e2   :  { %3827 = vst.msk [vmem:[%s6290_s3 + $0x20] sm:$0xff] %vm6547_vm4, %v3795_v16  ;;  %v3796_v30 = vmax.f32 %v3764_v45, 0.0  ;;  %v4622_v7 = vpop.f32.mrb[8].mxu0  ;;  %vm6562_vm4 = vmmov %vm6441_vm0 }
 0x1e3   :  { %3830 = vst.msk [vmem:[%s6290_s3 + $0x38] sm:$0xff] %vm6548_vm8, %v3798_v58  ;;  %v4660_v48 = vadd.f32 %v4622_v7, %v4422_v52  ;;  %v3625_v50 = vpop.f32.mrb[9].mxu0  ;;  %vm6563_vm8 = vmmov %vm6441_vm0 }
 0x1e4   :  { %3828 = vst.msk [vmem:[%s6290_s3 + $0x28] sm:$0xff] %vm6549_vm11, %v3796_v30  ;;  %v4661_v31 = vadd.f32 %v3625_v50, %v1919_v51  ;;  %v4623_v14 = vpop.f32.mrb[10].mxu0  ;;  %vm6564_vm11 = vmmov %vm6441_vm0 }
 0x1e5   :  { %v3769_v29 = vadd.f32 %v4660_v48, %v6121_v57  ;;  %v4662_v35 = vadd.f32 %v4623_v14, %v4423_v3  ;;  %v3628_v46 = vpop.f32.mrb[11].mxu0 }
 0x1e6   :  { %v3767_v55 = vadd.f32 %v4661_v31, %v6121_v57  ;;  %v4663_v18 = vadd.f32 %v3628_v46, %v1922_v34 }
 0x1e7   :  { %v3801_v47 = vmax.f32 %v3769_v29, 0.0  ;;  %v3770_v0 = vadd.f32 %v4662_v35, %v6121_v57 }
 0x1e8   :  { %v3799_v24 = vmax.f32 %v3767_v55, 0.0  ;;  %v3768_v4 = vadd.f32 %v4663_v18, %v6121_v57 }
 0x1e9   :  { %3833 = vst.msk [vmem:[%s6290_s3 + $0x50] sm:$0xff] %vm6550_vm6, %v3801_v47  ;;  %v3802_v15 = vmax.f32 %v3770_v0, 0.0  ;;  %vm6565_vm6 = vmmov %vm6441_vm0 }
 0x1ea   :  { %3831 = vst.msk [vmem:[%s6290_s3 + $0x40] sm:$0xff] %vm6551_vm2, %v3799_v24  ;;  %v3800_v9 = vmax.f32 %v3768_v4, 0.0  ;;  %v4626_v8 = vpop.f32.mrb[12].mxu0  ;;  %vm6566_vm2 = vmmov %vm6441_vm0 }
 0x1eb   :  { %3834 = vst.msk [vmem:[%s6290_s3 + $0x58] sm:$0xff] %vm6552_vm14, %v3802_v15  ;;  %v4664_v12 = vadd.f32 %v4626_v8, %v6110_v39  ;;  %v3641_v26 = vpop.f32.mrb[13].mxu0  ;;  %vm6567_vm14 = vmmov %vm6441_vm0 }
 0x1ec   :  { %3832 = vst.msk [vmem:[%s6290_s3 + $0x48] sm:$0xff] %vm6553_vm7, %v3800_v9  ;;  %v4665_v49 = vadd.f32 %v3641_v26, %v6112_v56  ;;  %v4627_v19 = vpop.f32.mrb[14].mxu0  ;;  %vm6568_vm7 = vmmov %vm6441_vm0 }
 0x1ed   :  { %v3773_v40 = vadd.f32 %v4664_v12, %v6121_v57  ;;  %v4666_v5 = vadd.f32 %v4627_v19, %v6114_v23  ;;  %v3644_v52 = vpop.f32.mrb[15].mxu0 }
 0x1ee   :  { %v3771_v51 = vadd.f32 %v4665_v49, %v6121_v57  ;;  %v4667_v3 = vadd.f32 %v3644_v52, %v6116_v13 }
 0x1ef   :  { %v3805_v34 = vmax.f32 %v3773_v40, 0.0  ;;  %v3774_v39 = vadd.f32 %v4666_v5, %v6121_v57 }
 0x1f0   :  { %v3803_v2 = vmax.f32 %v3771_v51, 0.0  ;;  %v3772_v60 = vadd.f32 %v4667_v3, %v6121_v57 }
 0x1f1   :  { %3837 = vst.msk [vmem:[%s6290_s3 + $0x70] sm:$0xff] %vm6554_vm13, %v3805_v34  ;;  %v3806_v56 = vmax.f32 %v3774_v39, 0.0  ;;  %v4470_v1 = vpop.f32.mrb[16].mxu1  ;;  %vm6569_vm13 = vmmov %vm6441_vm0 }
 0x1f2   :  { %3835 = vst.msk [vmem:[%s6290_s3 + $0x60] sm:$0xff] %vm6555_vm15, %v3803_v2  ;;  %v3804_v23 = vmax.f32 %v3772_v60, 0.0  ;;  %v4630_v13 = vpop.f32.mrb[16].mxu0  ;;  %v2273_v17 = vpop.f32.mrb[17].mxu1  ;;  %vm6570_vm15 = vmmov %vm6441_vm0 }
 0x1f3   :  { %3838 = vst.msk [vmem:[%s6290_s3 + $0x78] sm:$0xff] %vm6556_vm9, %v3806_v56  ;;  %v4668_v63 = vadd.f32 %v4630_v13, %v4470_v1  ;;  %v3657_v37 = vpop.f32.mrb[17].mxu0  ;;  %v4471_v20 = vpop.f32.mrb[18].mxu1  ;;  %vm6571_vm9 = vmmov %vm6441_vm0 }
 0x1f4   :  { %3836 = vst.msk [vmem:[%s6290_s3 + $0x68] sm:$0xff] %vm6557_vm3, %v3804_v23  ;;  %v4669_v36 = vadd.f32 %v3657_v37, %v2273_v17  ;;  %v4631_v10 = vpop.f32.mrb[18].mxu0  ;;  %v2276_v27 = vpop.f32.mrb[19].mxu1  ;;  %vm6572_vm3 = vmmov %vm6441_vm0 }
 0x1f5   :  { %v3777_v6 = vadd.f32 %v4668_v63, %v6121_v57  ;;  %v4670_v11 = vadd.f32 %v4631_v10, %v4471_v20  ;;  %v3660_v44 = vpop.f32.mrb[19].mxu0 }
 0x1f6   :  { %v3775_v43 = vadd.f32 %v4669_v36, %v6121_v57  ;;  %v4671_v32 = vadd.f32 %v3660_v44, %v2276_v27 }
 0x1f7   :  { %v3809_v25 = vmax.f32 %v3777_v6, 0.0  ;;  %v3778_v54 = vadd.f32 %v4670_v11, %v6121_v57 }
 0x1f8   :  { %v3807_v22 = vmax.f32 %v3775_v43, 0.0  ;;  %v3776_v41 = vadd.f32 %v4671_v32, %v6121_v57 }
 0x1f9   :  { %3841 = vst.msk [vmem:[%s6290_s3 + $0x90] sm:$0xff] %vm6558_vm12, %v3809_v25  ;;  %v3810_v21 = vmax.f32 %v3778_v54, 0.0  ;;  %v4474_v42 = vpop.f32.mrb[20].mxu1 }
 0x1fa   :  { %3839 = vst.msk [vmem:[%s6290_s3 + $0x80] sm:$0xff] %vm6559_vm10, %v3807_v22  ;;  %v3808_v61 = vmax.f32 %v3776_v41, 0.0  ;;  %v4634_v53 = vpop.f32.mrb[20].mxu0  ;;  %v2289_v28 = vpop.f32.mrb[21].mxu1 }
 0x1fb   :  { %3842 = vst.msk [vmem:[%s6290_s3 + $0x98] sm:$0xff] %vm6560_vm5, %v3810_v21  ;;  %v4672_v33 = vadd.f32 %v4634_v53, %v4474_v42  ;;  %v3673_v38 = vpop.f32.mrb[21].mxu0  ;;  %v4475_v59 = vpop.f32.mrb[22].mxu1 }
 0x1fc   :  { %3840 = vst.msk [vmem:[%s6290_s3 + $0x88] sm:$0xff] %vm6441_vm0, %v3808_v61  ;;  %v4673_v62 = vadd.f32 %v3673_v38, %v2289_v28  ;;  %v4635_v16 = vpop.f32.mrb[22].mxu0  ;;  %v2292_v45 = vpop.f32.mrb[23].mxu1 }
 0x1fd   :  { %v3781_v58 = vadd.f32 %v4672_v33, %v6121_v57  ;;  %v4674_v30 = vadd.f32 %v4635_v16, %v4475_v59  ;;  %v3676_v7 = vpop.f32.mrb[23].mxu0 }
 0x1fe   :  { %v3779_v48 = vadd.f32 %v4673_v62, %v6121_v57  ;;  %v4675_v50 = vadd.f32 %v3676_v7, %v2292_v45 }
 0x1ff   :  { %v3813_v31 = vmax.f32 %v3781_v58, 0.0  ;;  %v3782_v14 = vadd.f32 %v4674_v30, %v6121_v57 }
 0x200   :  { %v3811_v29 = vmax.f32 %v3779_v48, 0.0  ;;  %v3780_v35 = vadd.f32 %v4675_v50, %v6121_v57 }
 0x201   :  { %3845 = vst.msk [vmem:[%s6290_s3 + $0xb0] sm:$0xff] %vm6561_vm1, %v3813_v31  ;;  %v3814_v46 = vmax.f32 %v3782_v14, 0.0  ;;  %v4478_v55 = vpop.f32.mrb[24].mxu1 }
 0x202   :  { %3843 = vst.msk [vmem:[%s6290_s3 + $0xa0] sm:$0xff] %vm6562_vm4, %v3811_v29  ;;  %v3812_v18 = vmax.f32 %v3780_v35, 0.0  ;;  %v4638_v47 = vpop.f32.mrb[24].mxu0  ;;  %v2305_v0 = vpop.f32.mrb[25].mxu1 }
 0x203   :  { %3846 = vst.msk [vmem:[%s6290_s3 + $0xb8] sm:$0xff] %vm6563_vm8, %v3814_v46  ;;  %v4676_v24 = vadd.f32 %v4638_v47, %v4478_v55  ;;  %v3689_v4 = vpop.f32.mrb[25].mxu0  ;;  %v4479_v15 = vpop.f32.mrb[26].mxu1 }
 0x204   :  { %3844 = vst.msk [vmem:[%s6290_s3 + $0xa8] sm:$0xff] %vm6564_vm11, %v3812_v18  ;;  %v4677_v9 = vadd.f32 %v3689_v4, %v2305_v0  ;;  %v4639_v8 = vpop.f32.mrb[26].mxu0  ;;  %v2308_v12 = vpop.f32.mrb[27].mxu1 }
 0x205   :  { %v3785_v26 = vadd.f32 %v4676_v24, %v6121_v57  ;;  %v4678_v49 = vadd.f32 %v4639_v8, %v4479_v15  ;;  %v3692_v19 = vpop.f32.mrb[27].mxu0 }
 0x206   :  { %v3783_v40 = vadd.f32 %v4677_v9, %v6121_v57  ;;  %v4679_v5 = vadd.f32 %v3692_v19, %v2308_v12 }
 0x207   :  { %v3817_v52 = vmax.f32 %v3785_v26, 0.0  ;;  %v3786_v51 = vadd.f32 %v4678_v49, %v6121_v57 }
 0x208   :  { %v3815_v3 = vmax.f32 %v3783_v40, 0.0  ;;  %v3784_v34 = vadd.f32 %v4679_v5, %v6121_v57 }
 0x209   :  { %3849 = vst.msk [vmem:[%s6290_s3 + $0xd0] sm:$0xff] %vm6565_vm6, %v3817_v52  ;;  %v3818_v39 = vmax.f32 %v3786_v51, 0.0  ;;  %v4482_v2 = vpop.f32.mrb[28].mxu1 }
 0x20a   :  { %3847 = vst.msk [vmem:[%s6290_s3 + $0xc0] sm:$0xff] %vm6566_vm2, %v3815_v3  ;;  %v3816_v60 = vmax.f32 %v3784_v34, 0.0  ;;  %v4642_v56 = vpop.f32.mrb[28].mxu0  ;;  %v2321_v1 = vpop.f32.mrb[29].mxu1 }
 0x20b   :  { %3850 = vst.msk [vmem:[%s6290_s3 + $0xd8] sm:$0xff] %vm6567_vm14, %v3818_v39  ;;  %v4680_v23 = vadd.f32 %v4642_v56, %v4482_v2  ;;  %v3705_v13 = vpop.f32.mrb[29].mxu0  ;;  %v4483_v17 = vpop.f32.mrb[30].mxu1 }
 0x20c   :  { %3848 = vst.msk [vmem:[%s6290_s3 + $0xc8] sm:$0xff] %vm6568_vm7, %v3816_v60  ;;  %v4681_v63 = vadd.f32 %v3705_v13, %v2321_v1  ;;  %v4643_v37 = vpop.f32.mrb[30].mxu0  ;;  %v2324_v20 = vpop.f32.mrb[31].mxu1 }
 0x20d   :  { %v3789_v36 = vadd.f32 %v4680_v23, %v6121_v57  ;;  %v4682_v10 = vadd.f32 %v4643_v37, %v4483_v17  ;;  %v3708_v27 = vpop.f32.mrb[31].mxu0 }
 0x20e   :  { %v3787_v6 = vadd.f32 %v4681_v63, %v6121_v57  ;;  %v4683_v11 = vadd.f32 %v3708_v27, %v2324_v20 }
 0x20f   :  { %v3821_v44 = vmax.f32 %v3789_v36, 0.0  ;;  %v3790_v43 = vadd.f32 %v4682_v10, %v6121_v57 }
 0x210   :  { %v3819_v32 = vmax.f32 %v3787_v6, 0.0  ;;  %v3788_v25 = vadd.f32 %v4683_v11, %v6121_v57 }
 0x211   :  { %3853 = vst.msk [vmem:[%s6290_s3 + $0xf0] sm:$0xff] %vm6569_vm13, %v3821_v44  ;;  %v3822_v54 = vmax.f32 %v3790_v43, 0.0 }
 0x212   :  { %3851 = vst.msk [vmem:[%s6290_s3 + $0xe0] sm:$0xff] %vm6570_vm15, %v3819_v32  ;;  %v3820_v22 = vmax.f32 %v3788_v25, 0.0 }
 0x213   :  { %3854 = vst.msk [vmem:[%s6290_s3 + $0xf8] sm:$0xff] %vm6571_vm9, %v3822_v54 }
 0x214   :  { %3852 = vst.msk [vmem:[%s6290_s3 + $0xe8] sm:$0xff] %vm6572_vm3, %v3820_v22 }

</bundles_post_ra>
